<compile_context>
chip_gen: v6e
topology: v6e:2x2x1
jax: 0.10.0
libtpu: 0.0.40
codegen_flags: <defaults>
</compile_context>

<pallas_src>
import math

import jax
import jax.numpy as jnp
from jax.experimental import pallas as pl
from jax.experimental.pallas import tpu as pltpu

# ----------------------------- synthetic ViT-B/16-style config -----------------------------
BATCH = 2
IN_CHANNELS = 4          # != 3  => mapping_conv path is exercised (folded into patch proj)
IMG = 32                 # (ViT-B/16 uses 224; scaled down for a small synthetic run)
PATCH = 16
NUM_PATCHES = (IMG // PATCH) ** 2
SEQ = NUM_PATCHES + 1    # + class token
HIDDEN = 32              # embedd_len (ViT-B/16: 768)
HEADS = 4                # (ViT-B/16: 12)
HEAD_DIM = HIDDEN // HEADS
MLP = 64                 # (ViT-B/16: 3072)
LAYERS = 2               # (ViT-B/16: 12)
LN_EPS = 1e-6            # torchvision ViT uses LayerNorm(eps=1e-6)
PPC = IN_CHANNELS * PATCH * PATCH   # flattened raw-Cin patch length (mapping_conv folded)


# ------------------------------------ fused ViT kernel --------------------------------------
def _ln_rows(x, g, b):
    """Row-wise LayerNorm over the last dim, f32 statistics. g, b are (1, D)."""
    mean = jnp.mean(x, axis=-1, keepdims=True)
    var = jnp.mean(jnp.square(x - mean), axis=-1, keepdims=True)
    return (x - mean) * jax.lax.rsqrt(var + LN_EPS) * g + b


def _vit_kernel(patches_ref, pos_ref, w_pe_ref,
                ln1_g_ref, ln1_b_ref, w_qkv_ref, b_q_ref, w_o_ref, b_o_ref,
                ln2_g_ref, ln2_b_ref, w1_ref, b1_ref, w2_ref, b2_ref,
                lnf_g_ref, lnf_b_ref, o_ref):
    """Whole ViT forward for the whole batch in one grid step.

    patches_ref: (B*NUM_PATCHES, PPC) bf16 — flattened raw-Cin patches (mapping_conv folded
                 into w_pe at prepare time).
    pos_ref:     (SEQ, HIDDEN) f32 — row 0 = cls + pos[0]; rows 1.. = pos[1:] + conv bias.
    All weights are full-extent resident VMEM blocks; matmuls use bf16 operands with f32
    accumulation; LayerNorm / softmax / epilogues stay f32.
    """
    bb = patches_ref.shape[0] // NUM_PATCHES            # per-block batch (static)

    # --- patch projection (mapping_conv + conv_proj folded): ONE matmul for all patches ---
    proj = jnp.dot(patches_ref[...], w_pe_ref[...],
                   preferred_element_type=jnp.float32)   # (bb*NP, HIDDEN) f32
    pos = pos_ref[...]                                   # (SEQ, HIDDEN) f32

    # assemble the token sequence: [cls+pos0 ; patches+pos1..] per image, stacked over batch
    rows = []
    for b in range(bb):
        rows.append(pos[0:1, :])
        rows.append(proj[b * NUM_PATCHES:(b + 1) * NUM_PATCHES, :] + pos[1:, :])
    xs = jnp.concatenate(rows, axis=0)                   # (bb*SEQ, HIDDEN) f32

    for l in range(LAYERS):                              # static unroll (LAYERS=2)
        # ---------------- self-attention block ----------------
        y = _ln_rows(xs, ln1_g_ref[l], ln1_b_ref[l])     # one LN chain over all rows
        y_b = y.astype(jnp.bfloat16)

        # fused Q/K/V: single (rows, 32) @ (32, 96) matmul
        qkv = jnp.dot(y_b, w_qkv_ref[l], preferred_element_type=jnp.float32)
        q = qkv[:, 0:HIDDEN] + b_q_ref[l]                # W_q / b_q pre-scaled by 1/sqrt(Dh)
        k = qkv[:, HIDDEN:2 * HIDDEN]                    # b_k dropped: cancels in softmax
        v = qkv[:, 2 * HIDDEN:3 * HIDDEN]                # b_v folded into b_o

        # scores for every (batch, head) pair, stacked along sublanes so the softmax
        # max/sum reductions run as ONE chain per layer
        s_parts = []
        for b in range(bb):
            r = slice(b * SEQ, (b + 1) * SEQ)
            for h in range(HEADS):
                c = slice(h * HEAD_DIM, (h + 1) * HEAD_DIM)
                s_parts.append(jax.lax.dot_general(
                    q[r, c], k[r, c], (((1,), (1,)), ((), ())),
                    preferred_element_type=jnp.float32))            # (SEQ, SEQ)
        s = jnp.concatenate(s_parts, axis=0)                         # (bb*HEADS*SEQ, SEQ)
        s = s - jnp.max(s, axis=-1, keepdims=True)
        p = jnp.exp(s)
        p = p * pl.reciprocal(jnp.sum(p, axis=-1, keepdims=True), approx=True)

        # per-head context, reassembled heads-along-lanes -> ONE out-projection matmul
        ctx_rows = []
        for b in range(bb):
            r = slice(b * SEQ, (b + 1) * SEQ)
            head_cols = []
            for h in range(HEADS):
                c = slice(h * HEAD_DIM, (h + 1) * HEAD_DIM)
                idx = b * HEADS + h
                p_bh = p[idx * SEQ:(idx + 1) * SEQ, :]               # (SEQ, SEQ)
                head_cols.append(jnp.dot(p_bh, v[r, c],
                                         preferred_element_type=jnp.float32))
            ctx_rows.append(jnp.concatenate(head_cols, axis=-1))     # (SEQ, HIDDEN)
        ctx = jnp.concatenate(ctx_rows, axis=0)                      # (bb*SEQ, HIDDEN)

        attn = jnp.dot(ctx.astype(jnp.bfloat16), w_o_ref[l],
                       preferred_element_type=jnp.float32)
        xs = xs + attn + b_o_ref[l]                      # b_o includes folded b_v @ W_o

        # ---------------- MLP block ----------------
        y = _ln_rows(xs, ln2_g_ref[l], ln2_b_ref[l])
        h1 = jnp.dot(y.astype(jnp.bfloat16), w1_ref[l],
                     preferred_element_type=jnp.float32) + b1_ref[l]
        # TODO(synk): torch nn.GELU() is the exact erf-based GELU; tanh approximation is used
        # because erf is not guaranteed to lower in Mosaic (max elementwise err ~3e-3).
        h1 = jax.nn.gelu(h1, approximate=True)           # f32 epilogue (v5e-safe)
        h2 = jnp.dot(h1.astype(jnp.bfloat16), w2_ref[l],
                     preferred_element_type=jnp.float32) + b2_ref[l]
        xs = xs + h2

    # --- final LayerNorm on the class-token rows only; heads.head == Identity ---
    cls_rows = jnp.concatenate([xs[b * SEQ:b * SEQ + 1, :] for b in range(bb)], axis=0)
    o_ref[...] = _ln_rows(cls_rows, lnf_g_ref[...], lnf_b_ref[...]).astype(o_ref.dtype)


# ------------------------------------- parameters -------------------------------------------
def init_params(key):
    """Synthetic weights in (faithful) torch layouts."""
    ks = iter(jax.random.split(key, 64))
    std = 0.02

    def nrm(shape):
        return jax.random.normal(next(ks), shape, jnp.float32) * std

    p = {
        # mapping_conv = nn.Conv2d(Cin, 3, 1): torch weight (3, Cin, 1, 1) stored as (3, Cin)
        "map_w": nrm((3, IN_CHANNELS)),
        "map_b": nrm((3,)),
        # conv_proj = nn.Conv2d(3, HIDDEN, PATCH, stride=PATCH): torch layout (HIDDEN, 3, P, P)
        "patch_w": nrm((HIDDEN, 3, PATCH, PATCH)),
        "patch_b": nrm((HIDDEN,)),
        "cls": nrm((1, 1, HIDDEN)),
        "pos": nrm((1, SEQ, HIDDEN)),
        "ln_f_g": jnp.ones((HIDDEN,), jnp.float32),
        "ln_f_b": jnp.zeros((HIDDEN,), jnp.float32),
        "layers": [],
    }
    for _ in range(LAYERS):
        p["layers"].append({
            "ln1_g": jnp.ones((HIDDEN,), jnp.float32),
            "ln1_b": jnp.zeros((HIDDEN,), jnp.float32),
            "w_qkv": nrm((HIDDEN, 3 * HIDDEN)),   # == MultiheadAttention.in_proj_weight.T
            "b_qkv": nrm((3 * HIDDEN,)),
            "w_o": nrm((HIDDEN, HIDDEN)),         # == out_proj.weight.T
            "b_o": nrm((HIDDEN,)),
            "ln2_g": jnp.ones((HIDDEN,), jnp.float32),
            "ln2_b": jnp.zeros((HIDDEN,), jnp.float32),
            "w1": nrm((HIDDEN, MLP)),
            "b1": nrm((MLP,)),
            "w2": nrm((MLP, HIDDEN)),
            "b2": nrm((HIDDEN,)),
        })
    return p


def prepare_params(p):
    """One-time weight folding / packing (plain-JAX glue, runs once before jit):
       * fold mapping_conv into the patch-projection weight/bias,
       * fold the class token and the conv bias into the position embedding,
       * pre-scale W_q/b_q by 1/sqrt(head_dim); drop b_k (exact softmax cancellation);
         fold b_v through the out projection into b_o (softmax rows sum to 1),
       * keep w_qkv packed (one matmul/layer), stack per-layer weights,
         cast matmul operands to bf16 (biases / LN params stay f32)."""
    scale = 1.0 / math.sqrt(HEAD_DIM)

    # W'[cin, p, q, h] = sum_c W_patch[h, c, p, q] * W_map[c, cin]
    w_pe = jnp.einsum("hcpq,ci->ipqh", p["patch_w"], p["map_w"]).reshape(PPC, HIDDEN)
    b_pe = p["patch_b"] + jnp.einsum("hcpq,c->h", p["patch_w"], p["map_b"])

    # pos row 0 absorbs the class token; patch rows absorb the folded conv bias.
    pos = p["pos"][0]
    pos = pos.at[0].add(p["cls"][0, 0])
    pos = pos.at[1:].add(b_pe)

    def stack(name):
        return jnp.stack([lp[name] for lp in p["layers"]])

    w_qkv = stack("w_qkv")                                # (L, HIDDEN, 3*HIDDEN)
    b_qkv = stack("b_qkv")                                # (L, 3*HIDDEN)
    w_o = stack("w_o")                                    # (L, HIDDEN, HIDDEN)
    b_o = stack("b_o")                                    # (L, HIDDEN)
    b_v = b_qkv[:, 2 * HIDDEN:]                           # (L, HIDDEN)

    w_qkv = w_qkv.at[:, :, :HIDDEN].multiply(scale)       # pre-scale Q columns
    b_q = (b_qkv[:, :HIDDEN] * scale).reshape(LAYERS, 1, HIDDEN)
    # b_k dropped; b_v folded:  p @ (v + 1 b_v^T) @ W_o  ==  p @ v @ W_o + b_v @ W_o
    b_o = (b_o + jnp.einsum("lh,lho->lo", b_v, w_o)).reshape(LAYERS, 1, HIDDEN)

    return {
        "w_pe": w_pe.astype(jnp.bfloat16),
        "pos": pos,
        "ln1_g": stack("ln1_g").reshape(LAYERS, 1, HIDDEN),
        "ln1_b": stack("ln1_b").reshape(LAYERS, 1, HIDDEN),
        "w_qkv": w_qkv.astype(jnp.bfloat16),
        "b_q": b_q,
        "w_o": w_o.astype(jnp.bfloat16),
        "b_o": b_o,
        "ln2_g": stack("ln2_g").reshape(LAYERS, 1, HIDDEN),
        "ln2_b": stack("ln2_b").reshape(LAYERS, 1, HIDDEN),
        "w1": stack("w1").astype(jnp.bfloat16),
        "b1": stack("b1").reshape(LAYERS, 1, MLP),
        "w2": stack("w2").astype(jnp.bfloat16),
        "b2": stack("b2").reshape(LAYERS, 1, HIDDEN),
        "ln_f_g": p["ln_f_g"].reshape(1, HIDDEN),
        "ln_f_b": p["ln_f_b"].reshape(1, HIDDEN),
    }


# --------------------------------------- forward --------------------------------------------
def _cost_estimate(dp, patches):
    rows = BATCH * SEQ
    per_layer = (2 * rows * HIDDEN * 3 * HIDDEN                     # fused q/k/v projection
                 + 4 * BATCH * HEADS * SEQ * SEQ * HEAD_DIM         # q@k^T and p@v
                 + 2 * rows * HIDDEN * HIDDEN                       # out projection
                 + 4 * rows * HIDDEN * MLP)                         # MLP
    flops = 2 * BATCH * NUM_PATCHES * PPC * HIDDEN + LAYERS * per_layer
    transcendentals = LAYERS * (BATCH * HEADS * SEQ * SEQ + BATCH * HEADS * SEQ + rows * MLP)
    bytes_accessed = (int(patches.size) * patches.dtype.itemsize
                      + sum(int(v.size) * v.dtype.itemsize for v in dp.values())
                      + BATCH * HIDDEN * 4)
    return pl.CostEstimate(flops=flops, transcendentals=transcendentals,
                           bytes_accessed=bytes_accessed)


def vit_b16_image_embedd(image, dp):
    """image: NCHW (B, Cin, H, W) float32 — exactly like the PyTorch module. Returns (B, HIDDEN)."""
    B, C, H, W = image.shape
    nh, nw = H // PATCH, W // PATCH

    # Patchify (pure layout glue, fused by XLA with the bf16 cast):
    # (B, Cin, H, W) -> (B*nh*nw, Cin*P*P), per-patch flatten order (cin, p, q) matches w_pe.
    x = image.astype(jnp.bfloat16)
    patches = x.reshape(B, C, nh, PATCH, nw, PATCH)
    patches = jnp.transpose(patches, (0, 2, 4, 1, 3, 5)).reshape(B * nh * nw, C * PATCH * PATCH)

    def full(a):
        nd = a.ndim
        return pl.BlockSpec(a.shape, lambda i, _nd=nd: (0,) * _nd)   # resident full-array block

    # Single grid step: whole batch in one block (best for the 1-TC v5e/v6e chips).
    # TODO(synk): on v7x with larger B, split the batch over a grid=(2,) "parallel" axis to
    # shard across the 2 TensorCores; with B=2 the single-block form is equivalent or better.
    out = pl.pallas_call(
        _vit_kernel,
        out_shape=jax.ShapeDtypeStruct((B, HIDDEN), jnp.float32),
        grid=(1,),
        in_specs=[
            pl.BlockSpec((B * NUM_PATCHES, PPC), lambda i: (0, 0)),
            full(dp["pos"]), full(dp["w_pe"]),
            full(dp["ln1_g"]), full(dp["ln1_b"]),
            full(dp["w_qkv"]), full(dp["b_q"]),
            full(dp["w_o"]), full(dp["b_o"]),
            full(dp["ln2_g"]), full(dp["ln2_b"]),
            full(dp["w1"]), full(dp["b1"]), full(dp["w2"]), full(dp["b2"]),
            full(dp["ln_f_g"]), full(dp["ln_f_b"]),
        ],
        out_specs=pl.BlockSpec((B, HIDDEN), lambda i: (0, 0)),
        compiler_params=pltpu.CompilerParams(dimension_semantics=("arbitrary",)),
        cost_estimate=_cost_estimate(dp, patches),
    )(patches, dp["pos"], dp["w_pe"],
      dp["ln1_g"], dp["ln1_b"], dp["w_qkv"], dp["b_q"], dp["w_o"], dp["b_o"],
      dp["ln2_g"], dp["ln2_b"], dp["w1"], dp["b1"], dp["w2"], dp["b2"],
      dp["ln_f_g"], dp["ln_f_b"])
    return out                                                       # (B, HIDDEN)


# ----------------------------------------- main ----------------------------------------------
if __name__ == "__main__":
    key = jax.random.PRNGKey(0)
    pkey, xkey = jax.random.split(key)
    params = init_params(pkey)
    dev_params = prepare_params(params)     # one-time folding/packing, outside the jitted step
    image = jax.random.normal(xkey, (BATCH, IN_CHANNELS, IMG, IMG), jnp.float32)

    fwd = jax.jit(vit_b16_image_embedd)
    embedd = fwd(image, dev_params)
    jax.block_until_ready(embedd)

    assert embedd.shape == (BATCH, HIDDEN), embedd.shape
    assert embedd.dtype == jnp.float32
    assert bool(jnp.all(jnp.isfinite(embedd)))
    print("KERNEL_OK")
</pallas_src>

<mosaic_0001>
module attributes {stable_mosaic.version = 11 : i64} {
  func.func @_vit_kernel(%arg0: i32, %arg1: memref<8x1024xbf16, #tpu.memory_space<vmem>>, %arg2: memref<5x32xf32, #tpu.memory_space<vmem>>, %arg3: memref<1024x32xbf16, #tpu.memory_space<vmem>>, %arg4: memref<2x1x32xf32, #tpu.memory_space<vmem>>, %arg5: memref<2x1x32xf32, #tpu.memory_space<vmem>>, %arg6: memref<2x32x96xbf16, #tpu.memory_space<vmem>>, %arg7: memref<2x1x32xf32, #tpu.memory_space<vmem>>, %arg8: memref<2x32x32xbf16, #tpu.memory_space<vmem>>, %arg9: memref<2x1x32xf32, #tpu.memory_space<vmem>>, %arg10: memref<2x1x32xf32, #tpu.memory_space<vmem>>, %arg11: memref<2x1x32xf32, #tpu.memory_space<vmem>>, %arg12: memref<2x32x64xbf16, #tpu.memory_space<vmem>>, %arg13: memref<2x1x64xf32, #tpu.memory_space<vmem>>, %arg14: memref<2x64x32xbf16, #tpu.memory_space<vmem>>, %arg15: memref<2x1x32xf32, #tpu.memory_space<vmem>>, %arg16: memref<1x32xf32, #tpu.memory_space<vmem>>, %arg17: memref<1x32xf32, #tpu.memory_space<vmem>>, %arg18: memref<2x32xf32, #tpu.memory_space<vmem>>) attributes {dimension_semantics = [#tpu.dimension_semantics<arbitrary>], iteration_bounds = array<i64: 1>, scalar_prefetch = 0 : i64, scratch_operands = 0 : i64, tpu.core_type = #tpu.core_type<tc>, window_params = [{pipeline_mode = #tpu.pipeline_mode<synchronous>, transform_indices = @transform_0, window_bounds = array<i64: 8, 1024>}, {pipeline_mode = #tpu.pipeline_mode<synchronous>, transform_indices = @transform_1, window_bounds = array<i64: 5, 32>}, {pipeline_mode = #tpu.pipeline_mode<synchronous>, transform_indices = @transform_2, window_bounds = array<i64: 1024, 32>}, {pipeline_mode = #tpu.pipeline_mode<synchronous>, transform_indices = @transform_3, window_bounds = array<i64: 2, 1, 32>}, {pipeline_mode = #tpu.pipeline_mode<synchronous>, transform_indices = @transform_4, window_bounds = array<i64: 2, 1, 32>}, {pipeline_mode = #tpu.pipeline_mode<synchronous>, transform_indices = @transform_5, window_bounds = array<i64: 2, 32, 96>}, {pipeline_mode = #tpu.pipeline_mode<synchronous>, transform_indices = @transform_6, window_bounds = array<i64: 2, 1, 32>}, {pipeline_mode = #tpu.pipeline_mode<synchronous>, transform_indices = @transform_7, window_bounds = array<i64: 2, 32, 32>}, {pipeline_mode = #tpu.pipeline_mode<synchronous>, transform_indices = @transform_8, window_bounds = array<i64: 2, 1, 32>}, {pipeline_mode = #tpu.pipeline_mode<synchronous>, transform_indices = @transform_9, window_bounds = array<i64: 2, 1, 32>}, {pipeline_mode = #tpu.pipeline_mode<synchronous>, transform_indices = @transform_10, window_bounds = array<i64: 2, 1, 32>}, {pipeline_mode = #tpu.pipeline_mode<synchronous>, transform_indices = @transform_11, window_bounds = array<i64: 2, 32, 64>}, {pipeline_mode = #tpu.pipeline_mode<synchronous>, transform_indices = @transform_12, window_bounds = array<i64: 2, 1, 64>}, {pipeline_mode = #tpu.pipeline_mode<synchronous>, transform_indices = @transform_13, window_bounds = array<i64: 2, 64, 32>}, {pipeline_mode = #tpu.pipeline_mode<synchronous>, transform_indices = @transform_14, window_bounds = array<i64: 2, 1, 32>}, {pipeline_mode = #tpu.pipeline_mode<synchronous>, transform_indices = @transform_15, window_bounds = array<i64: 1, 32>}, {pipeline_mode = #tpu.pipeline_mode<synchronous>, transform_indices = @transform_16, window_bounds = array<i64: 1, 32>}, {pipeline_mode = #tpu.pipeline_mode<synchronous>, transform_indices = @transform_17, window_bounds = array<i64: 2, 32>}]} {
    %c0 = arith.constant 0 : index
    %c0_0 = arith.constant 0 : index
    %0 = vector.load %arg1[%c0, %c0_0] : memref<8x1024xbf16, #tpu.memory_space<vmem>>, vector<8x1024xbf16>
    %c0_1 = arith.constant 0 : index
    %c0_2 = arith.constant 0 : index
    %1 = vector.load %arg3[%c0_1, %c0_2] : memref<1024x32xbf16, #tpu.memory_space<vmem>>, vector<1024x32xbf16>
    %cst = arith.constant dense<0.000000e+00> : vector<8x32xf32>
    %2 = tpu.matmul %0, %1, %cst {dimension_numbers = #tpu.dot_dimension_numbers<[1], [0], [0], [1], [0, 0, 1, 1], [], []>} : vector<8x1024xbf16>, vector<1024x32xbf16>, vector<8x32xf32> -> vector<8x32xf32>
    %c0_3 = arith.constant 0 : index
    %c0_4 = arith.constant 0 : index
    %3 = vector.load %arg2[%c0_3, %c0_4] : memref<5x32xf32, #tpu.memory_space<vmem>>, vector<5x32xf32>
    %4 = vector.extract_strided_slice %3 {offsets = [0, 0], sizes = [1, 32], strides = [1, 1]} : vector<5x32xf32> to vector<1x32xf32>
    %5 = vector.extract_strided_slice %2 {offsets = [0, 0], sizes = [4, 32], strides = [1, 1]} : vector<8x32xf32> to vector<4x32xf32>
    %6 = vector.extract_strided_slice %3 {offsets = [1, 0], sizes = [4, 32], strides = [1, 1]} : vector<5x32xf32> to vector<4x32xf32>
    %7 = arith.addf %5, %6 : vector<4x32xf32>
    %8 = vector.extract_strided_slice %3 {offsets = [0, 0], sizes = [1, 32], strides = [1, 1]} : vector<5x32xf32> to vector<1x32xf32>
    %9 = vector.extract_strided_slice %2 {offsets = [4, 0], sizes = [4, 32], strides = [1, 1]} : vector<8x32xf32> to vector<4x32xf32>
    %10 = vector.extract_strided_slice %3 {offsets = [1, 0], sizes = [4, 32], strides = [1, 1]} : vector<5x32xf32> to vector<4x32xf32>
    %11 = arith.addf %9, %10 : vector<4x32xf32>
    %12 = tpu.concatenate %4, %7, %8, %11 in 0 : vector<1x32xf32>, vector<4x32xf32>, vector<1x32xf32>, vector<4x32xf32> -> vector<10x32xf32>
    %c0_5 = arith.constant 0 : index
    %c0_6 = arith.constant 0 : index
    %c0_7 = arith.constant 0 : index
    %13 = vector.load %arg4[%c0_5, %c0_6, %c0_7] : memref<2x1x32xf32, #tpu.memory_space<vmem>>, vector<1x1x32xf32>
    %14 = vector.shape_cast %13 : vector<1x1x32xf32> to vector<1x32xf32>
    %c0_8 = arith.constant 0 : index
    %c0_9 = arith.constant 0 : index
    %c0_10 = arith.constant 0 : index
    %15 = vector.load %arg5[%c0_8, %c0_9, %c0_10] : memref<2x1x32xf32, #tpu.memory_space<vmem>>, vector<1x1x32xf32>
    %16 = vector.shape_cast %15 : vector<1x1x32xf32> to vector<1x32xf32>
    %cst_11 = arith.constant dense<0.000000e+00> : vector<10xf32>
    %17 = vector.multi_reduction <add>, %12, %cst_11 [1] : vector<10x32xf32> to vector<10xf32>
    %18 = vector.shape_cast %17 : vector<10xf32> to vector<10x1xf32>
    %cst_12 = arith.constant 3.200000e+01 : f32
    %19 = vector.broadcast %cst_12 : f32 to vector<10x1xf32>
    %20 = arith.divf %18, %19 : vector<10x1xf32>
    %21 = vector.broadcast %20 : vector<10x1xf32> to vector<10x32xf32>
    %22 = arith.subf %12, %21 : vector<10x32xf32>
    %23 = arith.mulf %22, %22 : vector<10x32xf32>
    %cst_13 = arith.constant dense<0.000000e+00> : vector<10xf32>
    %24 = vector.multi_reduction <add>, %23, %cst_13 [1] : vector<10x32xf32> to vector<10xf32>
    %25 = vector.shape_cast %24 : vector<10xf32> to vector<10x1xf32>
    %cst_14 = arith.constant 3.200000e+01 : f32
    %26 = vector.broadcast %cst_14 : f32 to vector<10x1xf32>
    %27 = arith.divf %25, %26 : vector<10x1xf32>
    %28 = vector.broadcast %20 : vector<10x1xf32> to vector<10x32xf32>
    %29 = arith.subf %12, %28 : vector<10x32xf32>
    %cst_15 = arith.constant 9.99999997E-7 : f32
    %30 = vector.broadcast %cst_15 : f32 to vector<10x1xf32>
    %31 = arith.addf %27, %30 : vector<10x1xf32>
    %32 = math.rsqrt %31 : vector<10x1xf32>
    %33 = vector.broadcast %32 : vector<10x1xf32> to vector<10x32xf32>
    %34 = arith.mulf %29, %33 : vector<10x32xf32>
    %35 = vector.broadcast %14 : vector<1x32xf32> to vector<10x32xf32>
    %36 = arith.mulf %34, %35 : vector<10x32xf32>
    %37 = vector.broadcast %16 : vector<1x32xf32> to vector<10x32xf32>
    %38 = arith.addf %36, %37 : vector<10x32xf32>
    %39 = arith.truncf %38 : vector<10x32xf32> to vector<10x32xbf16>
    %c0_16 = arith.constant 0 : index
    %c0_17 = arith.constant 0 : index
    %c0_18 = arith.constant 0 : index
    %40 = vector.load %arg6[%c0_16, %c0_17, %c0_18] : memref<2x32x96xbf16, #tpu.memory_space<vmem>>, vector<1x32x96xbf16>
    %41 = vector.shape_cast %40 : vector<1x32x96xbf16> to vector<32x96xbf16>
    %cst_19 = arith.constant dense<0.000000e+00> : vector<10x96xf32>
    %42 = tpu.matmul %39, %41, %cst_19 {dimension_numbers = #tpu.dot_dimension_numbers<[1], [0], [0], [1], [0, 0, 1, 1], [], []>} : vector<10x32xbf16>, vector<32x96xbf16>, vector<10x96xf32> -> vector<10x96xf32>
    %43 = vector.extract_strided_slice %42 {offsets = [0, 0], sizes = [10, 32], strides = [1, 1]} : vector<10x96xf32> to vector<10x32xf32>
    %c0_20 = arith.constant 0 : index
    %c0_21 = arith.constant 0 : index
    %c0_22 = arith.constant 0 : index
    %44 = vector.load %arg7[%c0_20, %c0_21, %c0_22] : memref<2x1x32xf32, #tpu.memory_space<vmem>>, vector<1x1x32xf32>
    %45 = vector.shape_cast %44 : vector<1x1x32xf32> to vector<1x32xf32>
    %46 = vector.broadcast %45 : vector<1x32xf32> to vector<10x32xf32>
    %47 = arith.addf %43, %46 : vector<10x32xf32>
    %48 = vector.extract_strided_slice %42 {offsets = [0, 32], sizes = [10, 32], strides = [1, 1]} : vector<10x96xf32> to vector<10x32xf32>
    %49 = vector.extract_strided_slice %42 {offsets = [0, 64], sizes = [10, 32], strides = [1, 1]} : vector<10x96xf32> to vector<10x32xf32>
    %50 = vector.extract_strided_slice %47 {offsets = [0, 0], sizes = [5, 8], strides = [1, 1]} : vector<10x32xf32> to vector<5x8xf32>
    %51 = vector.extract_strided_slice %48 {offsets = [0, 0], sizes = [5, 8], strides = [1, 1]} : vector<10x32xf32> to vector<5x8xf32>
    %cst_23 = arith.constant dense<0.000000e+00> : vector<5x5xf32>
    %52 = tpu.matmul %50, %51, %cst_23 {dimension_numbers = #tpu.dot_dimension_numbers<[1], [1], [0], [0], [0, 0, 1, 0], [], []>} : vector<5x8xf32>, vector<5x8xf32>, vector<5x5xf32> -> vector<5x5xf32>
    %53 = vector.extract_strided_slice %47 {offsets = [0, 8], sizes = [5, 8], strides = [1, 1]} : vector<10x32xf32> to vector<5x8xf32>
    %54 = vector.extract_strided_slice %48 {offsets = [0, 8], sizes = [5, 8], strides = [1, 1]} : vector<10x32xf32> to vector<5x8xf32>
    %cst_24 = arith.constant dense<0.000000e+00> : vector<5x5xf32>
    %55 = tpu.matmul %53, %54, %cst_24 {dimension_numbers = #tpu.dot_dimension_numbers<[1], [1], [0], [0], [0, 0, 1, 0], [], []>} : vector<5x8xf32>, vector<5x8xf32>, vector<5x5xf32> -> vector<5x5xf32>
    %56 = vector.extract_strided_slice %47 {offsets = [0, 16], sizes = [5, 8], strides = [1, 1]} : vector<10x32xf32> to vector<5x8xf32>
    %57 = vector.extract_strided_slice %48 {offsets = [0, 16], sizes = [5, 8], strides = [1, 1]} : vector<10x32xf32> to vector<5x8xf32>
    %cst_25 = arith.constant dense<0.000000e+00> : vector<5x5xf32>
    %58 = tpu.matmul %56, %57, %cst_25 {dimension_numbers = #tpu.dot_dimension_numbers<[1], [1], [0], [0], [0, 0, 1, 0], [], []>} : vector<5x8xf32>, vector<5x8xf32>, vector<5x5xf32> -> vector<5x5xf32>
    %59 = vector.extract_strided_slice %47 {offsets = [0, 24], sizes = [5, 8], strides = [1, 1]} : vector<10x32xf32> to vector<5x8xf32>
    %60 = vector.extract_strided_slice %48 {offsets = [0, 24], sizes = [5, 8], strides = [1, 1]} : vector<10x32xf32> to vector<5x8xf32>
    %cst_26 = arith.constant dense<0.000000e+00> : vector<5x5xf32>
    %61 = tpu.matmul %59, %60, %cst_26 {dimension_numbers = #tpu.dot_dimension_numbers<[1], [1], [0], [0], [0, 0, 1, 0], [], []>} : vector<5x8xf32>, vector<5x8xf32>, vector<5x5xf32> -> vector<5x5xf32>
    %62 = vector.extract_strided_slice %47 {offsets = [5, 0], sizes = [5, 8], strides = [1, 1]} : vector<10x32xf32> to vector<5x8xf32>
    %63 = vector.extract_strided_slice %48 {offsets = [5, 0], sizes = [5, 8], strides = [1, 1]} : vector<10x32xf32> to vector<5x8xf32>
    %cst_27 = arith.constant dense<0.000000e+00> : vector<5x5xf32>
    %64 = tpu.matmul %62, %63, %cst_27 {dimension_numbers = #tpu.dot_dimension_numbers<[1], [1], [0], [0], [0, 0, 1, 0], [], []>} : vector<5x8xf32>, vector<5x8xf32>, vector<5x5xf32> -> vector<5x5xf32>
    %65 = vector.extract_strided_slice %47 {offsets = [5, 8], sizes = [5, 8], strides = [1, 1]} : vector<10x32xf32> to vector<5x8xf32>
    %66 = vector.extract_strided_slice %48 {offsets = [5, 8], sizes = [5, 8], strides = [1, 1]} : vector<10x32xf32> to vector<5x8xf32>
    %cst_28 = arith.constant dense<0.000000e+00> : vector<5x5xf32>
    %67 = tpu.matmul %65, %66, %cst_28 {dimension_numbers = #tpu.dot_dimension_numbers<[1], [1], [0], [0], [0, 0, 1, 0], [], []>} : vector<5x8xf32>, vector<5x8xf32>, vector<5x5xf32> -> vector<5x5xf32>
    %68 = vector.extract_strided_slice %47 {offsets = [5, 16], sizes = [5, 8], strides = [1, 1]} : vector<10x32xf32> to vector<5x8xf32>
    %69 = vector.extract_strided_slice %48 {offsets = [5, 16], sizes = [5, 8], strides = [1, 1]} : vector<10x32xf32> to vector<5x8xf32>
    %cst_29 = arith.constant dense<0.000000e+00> : vector<5x5xf32>
    %70 = tpu.matmul %68, %69, %cst_29 {dimension_numbers = #tpu.dot_dimension_numbers<[1], [1], [0], [0], [0, 0, 1, 0], [], []>} : vector<5x8xf32>, vector<5x8xf32>, vector<5x5xf32> -> vector<5x5xf32>
    %71 = vector.extract_strided_slice %47 {offsets = [5, 24], sizes = [5, 8], strides = [1, 1]} : vector<10x32xf32> to vector<5x8xf32>
    %72 = vector.extract_strided_slice %48 {offsets = [5, 24], sizes = [5, 8], strides = [1, 1]} : vector<10x32xf32> to vector<5x8xf32>
    %cst_30 = arith.constant dense<0.000000e+00> : vector<5x5xf32>
    %73 = tpu.matmul %71, %72, %cst_30 {dimension_numbers = #tpu.dot_dimension_numbers<[1], [1], [0], [0], [0, 0, 1, 0], [], []>} : vector<5x8xf32>, vector<5x8xf32>, vector<5x5xf32> -> vector<5x5xf32>
    %74 = tpu.concatenate %52, %55, %58, %61, %64, %67, %70, %73 in 0 : vector<5x5xf32>, vector<5x5xf32>, vector<5x5xf32>, vector<5x5xf32>, vector<5x5xf32>, vector<5x5xf32>, vector<5x5xf32>, vector<5x5xf32> -> vector<40x5xf32>
    %cst_31 = arith.constant dense<0xFF800000> : vector<40xf32>
    %75 = vector.multi_reduction <maximumf>, %74, %cst_31 [1] : vector<40x5xf32> to vector<40xf32>
    %76 = vector.shape_cast %75 : vector<40xf32> to vector<40x1xf32>
    %77 = vector.broadcast %76 : vector<40x1xf32> to vector<40x5xf32>
    %78 = arith.subf %74, %77 : vector<40x5xf32>
    %79 = math.exp %78 : vector<40x5xf32>
    %cst_32 = arith.constant dense<0.000000e+00> : vector<40xf32>
    %80 = vector.multi_reduction <add>, %79, %cst_32 [1] : vector<40x5xf32> to vector<40xf32>
    %81 = vector.shape_cast %80 : vector<40xf32> to vector<40x1xf32>
    %82 = tpu.reciprocal %81 {approx = true} : vector<40x1xf32> -> vector<40x1xf32>
    %83 = vector.broadcast %82 : vector<40x1xf32> to vector<40x5xf32>
    %84 = arith.mulf %79, %83 : vector<40x5xf32>
    %85 = vector.extract_strided_slice %84 {offsets = [0, 0], sizes = [5, 5], strides = [1, 1]} : vector<40x5xf32> to vector<5x5xf32>
    %86 = vector.extract_strided_slice %49 {offsets = [0, 0], sizes = [5, 8], strides = [1, 1]} : vector<10x32xf32> to vector<5x8xf32>
    %cst_33 = arith.constant dense<0.000000e+00> : vector<5x8xf32>
    %87 = tpu.matmul %85, %86, %cst_33 {dimension_numbers = #tpu.dot_dimension_numbers<[1], [0], [0], [1], [0, 0, 1, 1], [], []>} : vector<5x5xf32>, vector<5x8xf32>, vector<5x8xf32> -> vector<5x8xf32>
    %88 = vector.extract_strided_slice %84 {offsets = [5, 0], sizes = [5, 5], strides = [1, 1]} : vector<40x5xf32> to vector<5x5xf32>
    %89 = vector.extract_strided_slice %49 {offsets = [0, 8], sizes = [5, 8], strides = [1, 1]} : vector<10x32xf32> to vector<5x8xf32>
    %cst_34 = arith.constant dense<0.000000e+00> : vector<5x8xf32>
    %90 = tpu.matmul %88, %89, %cst_34 {dimension_numbers = #tpu.dot_dimension_numbers<[1], [0], [0], [1], [0, 0, 1, 1], [], []>} : vector<5x5xf32>, vector<5x8xf32>, vector<5x8xf32> -> vector<5x8xf32>
    %91 = vector.extract_strided_slice %84 {offsets = [10, 0], sizes = [5, 5], strides = [1, 1]} : vector<40x5xf32> to vector<5x5xf32>
    %92 = vector.extract_strided_slice %49 {offsets = [0, 16], sizes = [5, 8], strides = [1, 1]} : vector<10x32xf32> to vector<5x8xf32>
    %cst_35 = arith.constant dense<0.000000e+00> : vector<5x8xf32>
    %93 = tpu.matmul %91, %92, %cst_35 {dimension_numbers = #tpu.dot_dimension_numbers<[1], [0], [0], [1], [0, 0, 1, 1], [], []>} : vector<5x5xf32>, vector<5x8xf32>, vector<5x8xf32> -> vector<5x8xf32>
    %94 = vector.extract_strided_slice %84 {offsets = [15, 0], sizes = [5, 5], strides = [1, 1]} : vector<40x5xf32> to vector<5x5xf32>
    %95 = vector.extract_strided_slice %49 {offsets = [0, 24], sizes = [5, 8], strides = [1, 1]} : vector<10x32xf32> to vector<5x8xf32>
    %cst_36 = arith.constant dense<0.000000e+00> : vector<5x8xf32>
    %96 = tpu.matmul %94, %95, %cst_36 {dimension_numbers = #tpu.dot_dimension_numbers<[1], [0], [0], [1], [0, 0, 1, 1], [], []>} : vector<5x5xf32>, vector<5x8xf32>, vector<5x8xf32> -> vector<5x8xf32>
    %97 = tpu.concatenate %87, %90, %93, %96 in 1 : vector<5x8xf32>, vector<5x8xf32>, vector<5x8xf32>, vector<5x8xf32> -> vector<5x32xf32>
    %98 = vector.extract_strided_slice %84 {offsets = [20, 0], sizes = [5, 5], strides = [1, 1]} : vector<40x5xf32> to vector<5x5xf32>
    %99 = vector.extract_strided_slice %49 {offsets = [5, 0], sizes = [5, 8], strides = [1, 1]} : vector<10x32xf32> to vector<5x8xf32>
    %cst_37 = arith.constant dense<0.000000e+00> : vector<5x8xf32>
    %100 = tpu.matmul %98, %99, %cst_37 {dimension_numbers = #tpu.dot_dimension_numbers<[1], [0], [0], [1], [0, 0, 1, 1], [], []>} : vector<5x5xf32>, vector<5x8xf32>, vector<5x8xf32> -> vector<5x8xf32>
    %101 = vector.extract_strided_slice %84 {offsets = [25, 0], sizes = [5, 5], strides = [1, 1]} : vector<40x5xf32> to vector<5x5xf32>
    %102 = vector.extract_strided_slice %49 {offsets = [5, 8], sizes = [5, 8], strides = [1, 1]} : vector<10x32xf32> to vector<5x8xf32>
    %cst_38 = arith.constant dense<0.000000e+00> : vector<5x8xf32>
    %103 = tpu.matmul %101, %102, %cst_38 {dimension_numbers = #tpu.dot_dimension_numbers<[1], [0], [0], [1], [0, 0, 1, 1], [], []>} : vector<5x5xf32>, vector<5x8xf32>, vector<5x8xf32> -> vector<5x8xf32>
    %104 = vector.extract_strided_slice %84 {offsets = [30, 0], sizes = [5, 5], strides = [1, 1]} : vector<40x5xf32> to vector<5x5xf32>
    %105 = vector.extract_strided_slice %49 {offsets = [5, 16], sizes = [5, 8], strides = [1, 1]} : vector<10x32xf32> to vector<5x8xf32>
    %cst_39 = arith.constant dense<0.000000e+00> : vector<5x8xf32>
    %106 = tpu.matmul %104, %105, %cst_39 {dimension_numbers = #tpu.dot_dimension_numbers<[1], [0], [0], [1], [0, 0, 1, 1], [], []>} : vector<5x5xf32>, vector<5x8xf32>, vector<5x8xf32> -> vector<5x8xf32>
    %107 = vector.extract_strided_slice %84 {offsets = [35, 0], sizes = [5, 5], strides = [1, 1]} : vector<40x5xf32> to vector<5x5xf32>
    %108 = vector.extract_strided_slice %49 {offsets = [5, 24], sizes = [5, 8], strides = [1, 1]} : vector<10x32xf32> to vector<5x8xf32>
    %cst_40 = arith.constant dense<0.000000e+00> : vector<5x8xf32>
    %109 = tpu.matmul %107, %108, %cst_40 {dimension_numbers = #tpu.dot_dimension_numbers<[1], [0], [0], [1], [0, 0, 1, 1], [], []>} : vector<5x5xf32>, vector<5x8xf32>, vector<5x8xf32> -> vector<5x8xf32>
    %110 = tpu.concatenate %100, %103, %106, %109 in 1 : vector<5x8xf32>, vector<5x8xf32>, vector<5x8xf32>, vector<5x8xf32> -> vector<5x32xf32>
    %111 = tpu.concatenate %97, %110 in 0 : vector<5x32xf32>, vector<5x32xf32> -> vector<10x32xf32>
    %112 = arith.truncf %111 : vector<10x32xf32> to vector<10x32xbf16>
    %c0_41 = arith.constant 0 : index
    %c0_42 = arith.constant 0 : index
    %c0_43 = arith.constant 0 : index
    %113 = vector.load %arg8[%c0_41, %c0_42, %c0_43] : memref<2x32x32xbf16, #tpu.memory_space<vmem>>, vector<1x32x32xbf16>
    %114 = vector.shape_cast %113 : vector<1x32x32xbf16> to vector<32x32xbf16>
    %cst_44 = arith.constant dense<0.000000e+00> : vector<10x32xf32>
    %115 = tpu.matmul %112, %114, %cst_44 {dimension_numbers = #tpu.dot_dimension_numbers<[1], [0], [0], [1], [0, 0, 1, 1], [], []>} : vector<10x32xbf16>, vector<32x32xbf16>, vector<10x32xf32> -> vector<10x32xf32>
    %116 = arith.addf %12, %115 : vector<10x32xf32>
    %c0_45 = arith.constant 0 : index
    %c0_46 = arith.constant 0 : index
    %c0_47 = arith.constant 0 : index
    %117 = vector.load %arg9[%c0_45, %c0_46, %c0_47] : memref<2x1x32xf32, #tpu.memory_space<vmem>>, vector<1x1x32xf32>
    %118 = vector.shape_cast %117 : vector<1x1x32xf32> to vector<1x32xf32>
    %119 = vector.broadcast %118 : vector<1x32xf32> to vector<10x32xf32>
    %120 = arith.addf %116, %119 : vector<10x32xf32>
    %c0_48 = arith.constant 0 : index
    %c0_49 = arith.constant 0 : index
    %c0_50 = arith.constant 0 : index
    %121 = vector.load %arg10[%c0_48, %c0_49, %c0_50] : memref<2x1x32xf32, #tpu.memory_space<vmem>>, vector<1x1x32xf32>
    %122 = vector.shape_cast %121 : vector<1x1x32xf32> to vector<1x32xf32>
    %c0_51 = arith.constant 0 : index
    %c0_52 = arith.constant 0 : index
    %c0_53 = arith.constant 0 : index
    %123 = vector.load %arg11[%c0_51, %c0_52, %c0_53] : memref<2x1x32xf32, #tpu.memory_space<vmem>>, vector<1x1x32xf32>
    %124 = vector.shape_cast %123 : vector<1x1x32xf32> to vector<1x32xf32>
    %cst_54 = arith.constant dense<0.000000e+00> : vector<10xf32>
    %125 = vector.multi_reduction <add>, %120, %cst_54 [1] : vector<10x32xf32> to vector<10xf32>
    %126 = vector.shape_cast %125 : vector<10xf32> to vector<10x1xf32>
    %cst_55 = arith.constant 3.200000e+01 : f32
    %127 = vector.broadcast %cst_55 : f32 to vector<10x1xf32>
    %128 = arith.divf %126, %127 : vector<10x1xf32>
    %129 = vector.broadcast %128 : vector<10x1xf32> to vector<10x32xf32>
    %130 = arith.subf %120, %129 : vector<10x32xf32>
    %131 = arith.mulf %130, %130 : vector<10x32xf32>
    %cst_56 = arith.constant dense<0.000000e+00> : vector<10xf32>
    %132 = vector.multi_reduction <add>, %131, %cst_56 [1] : vector<10x32xf32> to vector<10xf32>
    %133 = vector.shape_cast %132 : vector<10xf32> to vector<10x1xf32>
    %cst_57 = arith.constant 3.200000e+01 : f32
    %134 = vector.broadcast %cst_57 : f32 to vector<10x1xf32>
    %135 = arith.divf %133, %134 : vector<10x1xf32>
    %136 = vector.broadcast %128 : vector<10x1xf32> to vector<10x32xf32>
    %137 = arith.subf %120, %136 : vector<10x32xf32>
    %cst_58 = arith.constant 9.99999997E-7 : f32
    %138 = vector.broadcast %cst_58 : f32 to vector<10x1xf32>
    %139 = arith.addf %135, %138 : vector<10x1xf32>
    %140 = math.rsqrt %139 : vector<10x1xf32>
    %141 = vector.broadcast %140 : vector<10x1xf32> to vector<10x32xf32>
    %142 = arith.mulf %137, %141 : vector<10x32xf32>
    %143 = vector.broadcast %122 : vector<1x32xf32> to vector<10x32xf32>
    %144 = arith.mulf %142, %143 : vector<10x32xf32>
    %145 = vector.broadcast %124 : vector<1x32xf32> to vector<10x32xf32>
    %146 = arith.addf %144, %145 : vector<10x32xf32>
    %147 = arith.truncf %146 : vector<10x32xf32> to vector<10x32xbf16>
    %c0_59 = arith.constant 0 : index
    %c0_60 = arith.constant 0 : index
    %c0_61 = arith.constant 0 : index
    %148 = vector.load %arg12[%c0_59, %c0_60, %c0_61] : memref<2x32x64xbf16, #tpu.memory_space<vmem>>, vector<1x32x64xbf16>
    %149 = vector.shape_cast %148 : vector<1x32x64xbf16> to vector<32x64xbf16>
    %cst_62 = arith.constant dense<0.000000e+00> : vector<10x64xf32>
    %150 = tpu.matmul %147, %149, %cst_62 {dimension_numbers = #tpu.dot_dimension_numbers<[1], [0], [0], [1], [0, 0, 1, 1], [], []>} : vector<10x32xbf16>, vector<32x64xbf16>, vector<10x64xf32> -> vector<10x64xf32>
    %c0_63 = arith.constant 0 : index
    %c0_64 = arith.constant 0 : index
    %c0_65 = arith.constant 0 : index
    %151 = vector.load %arg13[%c0_63, %c0_64, %c0_65] : memref<2x1x64xf32, #tpu.memory_space<vmem>>, vector<1x1x64xf32>
    %152 = vector.shape_cast %151 : vector<1x1x64xf32> to vector<1x64xf32>
    %153 = vector.broadcast %152 : vector<1x64xf32> to vector<10x64xf32>
    %154 = arith.addf %150, %153 : vector<10x64xf32>
    %155 = arith.mulf %154, %154 : vector<10x64xf32>
    %156 = arith.mulf %154, %155 : vector<10x64xf32>
    %cst_66 = arith.constant 4.471500e-02 : f32
    %157 = vector.broadcast %cst_66 : f32 to vector<10x64xf32>
    %158 = arith.mulf %157, %156 : vector<10x64xf32>
    %159 = arith.addf %154, %158 : vector<10x64xf32>
    %cst_67 = arith.constant 0.797884583 : f32
    %160 = vector.broadcast %cst_67 : f32 to vector<10x64xf32>
    %161 = arith.mulf %160, %159 : vector<10x64xf32>
    %162 = math.tanh %161 : vector<10x64xf32>
    %cst_68 = arith.constant 1.000000e+00 : f32
    %163 = vector.broadcast %cst_68 : f32 to vector<10x64xf32>
    %164 = arith.addf %163, %162 : vector<10x64xf32>
    %cst_69 = arith.constant 5.000000e-01 : f32
    %165 = vector.broadcast %cst_69 : f32 to vector<10x64xf32>
    %166 = arith.mulf %165, %164 : vector<10x64xf32>
    %167 = arith.mulf %154, %166 : vector<10x64xf32>
    %168 = arith.truncf %167 : vector<10x64xf32> to vector<10x64xbf16>
    %c0_70 = arith.constant 0 : index
    %c0_71 = arith.constant 0 : index
    %c0_72 = arith.constant 0 : index
    %169 = vector.load %arg14[%c0_70, %c0_71, %c0_72] : memref<2x64x32xbf16, #tpu.memory_space<vmem>>, vector<1x64x32xbf16>
    %170 = vector.shape_cast %169 : vector<1x64x32xbf16> to vector<64x32xbf16>
    %cst_73 = arith.constant dense<0.000000e+00> : vector<10x32xf32>
    %171 = tpu.matmul %168, %170, %cst_73 {dimension_numbers = #tpu.dot_dimension_numbers<[1], [0], [0], [1], [0, 0, 1, 1], [], []>} : vector<10x64xbf16>, vector<64x32xbf16>, vector<10x32xf32> -> vector<10x32xf32>
    %c0_74 = arith.constant 0 : index
    %c0_75 = arith.constant 0 : index
    %c0_76 = arith.constant 0 : index
    %172 = vector.load %arg15[%c0_74, %c0_75, %c0_76] : memref<2x1x32xf32, #tpu.memory_space<vmem>>, vector<1x1x32xf32>
    %173 = vector.shape_cast %172 : vector<1x1x32xf32> to vector<1x32xf32>
    %174 = vector.broadcast %173 : vector<1x32xf32> to vector<10x32xf32>
    %175 = arith.addf %171, %174 : vector<10x32xf32>
    %176 = arith.addf %120, %175 : vector<10x32xf32>
    %c1 = arith.constant 1 : index
    %c0_77 = arith.constant 0 : index
    %c0_78 = arith.constant 0 : index
    %177 = vector.load %arg4[%c1, %c0_77, %c0_78] : memref<2x1x32xf32, #tpu.memory_space<vmem>>, vector<1x1x32xf32>
    %178 = vector.shape_cast %177 : vector<1x1x32xf32> to vector<1x32xf32>
    %c1_79 = arith.constant 1 : index
    %c0_80 = arith.constant 0 : index
    %c0_81 = arith.constant 0 : index
    %179 = vector.load %arg5[%c1_79, %c0_80, %c0_81] : memref<2x1x32xf32, #tpu.memory_space<vmem>>, vector<1x1x32xf32>
    %180 = vector.shape_cast %179 : vector<1x1x32xf32> to vector<1x32xf32>
    %cst_82 = arith.constant dense<0.000000e+00> : vector<10xf32>
    %181 = vector.multi_reduction <add>, %176, %cst_82 [1] : vector<10x32xf32> to vector<10xf32>
    %182 = vector.shape_cast %181 : vector<10xf32> to vector<10x1xf32>
    %cst_83 = arith.constant 3.200000e+01 : f32
    %183 = vector.broadcast %cst_83 : f32 to vector<10x1xf32>
    %184 = arith.divf %182, %183 : vector<10x1xf32>
    %185 = vector.broadcast %184 : vector<10x1xf32> to vector<10x32xf32>
    %186 = arith.subf %176, %185 : vector<10x32xf32>
    %187 = arith.mulf %186, %186 : vector<10x32xf32>
    %cst_84 = arith.constant dense<0.000000e+00> : vector<10xf32>
    %188 = vector.multi_reduction <add>, %187, %cst_84 [1] : vector<10x32xf32> to vector<10xf32>
    %189 = vector.shape_cast %188 : vector<10xf32> to vector<10x1xf32>
    %cst_85 = arith.constant 3.200000e+01 : f32
    %190 = vector.broadcast %cst_85 : f32 to vector<10x1xf32>
    %191 = arith.divf %189, %190 : vector<10x1xf32>
    %192 = vector.broadcast %184 : vector<10x1xf32> to vector<10x32xf32>
    %193 = arith.subf %176, %192 : vector<10x32xf32>
    %cst_86 = arith.constant 9.99999997E-7 : f32
    %194 = vector.broadcast %cst_86 : f32 to vector<10x1xf32>
    %195 = arith.addf %191, %194 : vector<10x1xf32>
    %196 = math.rsqrt %195 : vector<10x1xf32>
    %197 = vector.broadcast %196 : vector<10x1xf32> to vector<10x32xf32>
    %198 = arith.mulf %193, %197 : vector<10x32xf32>
    %199 = vector.broadcast %178 : vector<1x32xf32> to vector<10x32xf32>
    %200 = arith.mulf %198, %199 : vector<10x32xf32>
    %201 = vector.broadcast %180 : vector<1x32xf32> to vector<10x32xf32>
    %202 = arith.addf %200, %201 : vector<10x32xf32>
    %203 = arith.truncf %202 : vector<10x32xf32> to vector<10x32xbf16>
    %c1_87 = arith.constant 1 : index
    %c0_88 = arith.constant 0 : index
    %c0_89 = arith.constant 0 : index
    %204 = vector.load %arg6[%c1_87, %c0_88, %c0_89] : memref<2x32x96xbf16, #tpu.memory_space<vmem>>, vector<1x32x96xbf16>
    %205 = vector.shape_cast %204 : vector<1x32x96xbf16> to vector<32x96xbf16>
    %cst_90 = arith.constant dense<0.000000e+00> : vector<10x96xf32>
    %206 = tpu.matmul %203, %205, %cst_90 {dimension_numbers = #tpu.dot_dimension_numbers<[1], [0], [0], [1], [0, 0, 1, 1], [], []>} : vector<10x32xbf16>, vector<32x96xbf16>, vector<10x96xf32> -> vector<10x96xf32>
    %207 = vector.extract_strided_slice %206 {offsets = [0, 0], sizes = [10, 32], strides = [1, 1]} : vector<10x96xf32> to vector<10x32xf32>
    %c1_91 = arith.constant 1 : index
    %c0_92 = arith.constant 0 : index
    %c0_93 = arith.constant 0 : index
    %208 = vector.load %arg7[%c1_91, %c0_92, %c0_93] : memref<2x1x32xf32, #tpu.memory_space<vmem>>, vector<1x1x32xf32>
    %209 = vector.shape_cast %208 : vector<1x1x32xf32> to vector<1x32xf32>
    %210 = vector.broadcast %209 : vector<1x32xf32> to vector<10x32xf32>
    %211 = arith.addf %207, %210 : vector<10x32xf32>
    %212 = vector.extract_strided_slice %206 {offsets = [0, 32], sizes = [10, 32], strides = [1, 1]} : vector<10x96xf32> to vector<10x32xf32>
    %213 = vector.extract_strided_slice %206 {offsets = [0, 64], sizes = [10, 32], strides = [1, 1]} : vector<10x96xf32> to vector<10x32xf32>
    %214 = vector.extract_strided_slice %211 {offsets = [0, 0], sizes = [5, 8], strides = [1, 1]} : vector<10x32xf32> to vector<5x8xf32>
    %215 = vector.extract_strided_slice %212 {offsets = [0, 0], sizes = [5, 8], strides = [1, 1]} : vector<10x32xf32> to vector<5x8xf32>
    %cst_94 = arith.constant dense<0.000000e+00> : vector<5x5xf32>
    %216 = tpu.matmul %214, %215, %cst_94 {dimension_numbers = #tpu.dot_dimension_numbers<[1], [1], [0], [0], [0, 0, 1, 0], [], []>} : vector<5x8xf32>, vector<5x8xf32>, vector<5x5xf32> -> vector<5x5xf32>
    %217 = vector.extract_strided_slice %211 {offsets = [0, 8], sizes = [5, 8], strides = [1, 1]} : vector<10x32xf32> to vector<5x8xf32>
    %218 = vector.extract_strided_slice %212 {offsets = [0, 8], sizes = [5, 8], strides = [1, 1]} : vector<10x32xf32> to vector<5x8xf32>
    %cst_95 = arith.constant dense<0.000000e+00> : vector<5x5xf32>
    %219 = tpu.matmul %217, %218, %cst_95 {dimension_numbers = #tpu.dot_dimension_numbers<[1], [1], [0], [0], [0, 0, 1, 0], [], []>} : vector<5x8xf32>, vector<5x8xf32>, vector<5x5xf32> -> vector<5x5xf32>
    %220 = vector.extract_strided_slice %211 {offsets = [0, 16], sizes = [5, 8], strides = [1, 1]} : vector<10x32xf32> to vector<5x8xf32>
    %221 = vector.extract_strided_slice %212 {offsets = [0, 16], sizes = [5, 8], strides = [1, 1]} : vector<10x32xf32> to vector<5x8xf32>
    %cst_96 = arith.constant dense<0.000000e+00> : vector<5x5xf32>
    %222 = tpu.matmul %220, %221, %cst_96 {dimension_numbers = #tpu.dot_dimension_numbers<[1], [1], [0], [0], [0, 0, 1, 0], [], []>} : vector<5x8xf32>, vector<5x8xf32>, vector<5x5xf32> -> vector<5x5xf32>
    %223 = vector.extract_strided_slice %211 {offsets = [0, 24], sizes = [5, 8], strides = [1, 1]} : vector<10x32xf32> to vector<5x8xf32>
    %224 = vector.extract_strided_slice %212 {offsets = [0, 24], sizes = [5, 8], strides = [1, 1]} : vector<10x32xf32> to vector<5x8xf32>
    %cst_97 = arith.constant dense<0.000000e+00> : vector<5x5xf32>
    %225 = tpu.matmul %223, %224, %cst_97 {dimension_numbers = #tpu.dot_dimension_numbers<[1], [1], [0], [0], [0, 0, 1, 0], [], []>} : vector<5x8xf32>, vector<5x8xf32>, vector<5x5xf32> -> vector<5x5xf32>
    %226 = vector.extract_strided_slice %211 {offsets = [5, 0], sizes = [5, 8], strides = [1, 1]} : vector<10x32xf32> to vector<5x8xf32>
    %227 = vector.extract_strided_slice %212 {offsets = [5, 0], sizes = [5, 8], strides = [1, 1]} : vector<10x32xf32> to vector<5x8xf32>
    %cst_98 = arith.constant dense<0.000000e+00> : vector<5x5xf32>
    %228 = tpu.matmul %226, %227, %cst_98 {dimension_numbers = #tpu.dot_dimension_numbers<[1], [1], [0], [0], [0, 0, 1, 0], [], []>} : vector<5x8xf32>, vector<5x8xf32>, vector<5x5xf32> -> vector<5x5xf32>
    %229 = vector.extract_strided_slice %211 {offsets = [5, 8], sizes = [5, 8], strides = [1, 1]} : vector<10x32xf32> to vector<5x8xf32>
    %230 = vector.extract_strided_slice %212 {offsets = [5, 8], sizes = [5, 8], strides = [1, 1]} : vector<10x32xf32> to vector<5x8xf32>
    %cst_99 = arith.constant dense<0.000000e+00> : vector<5x5xf32>
    %231 = tpu.matmul %229, %230, %cst_99 {dimension_numbers = #tpu.dot_dimension_numbers<[1], [1], [0], [0], [0, 0, 1, 0], [], []>} : vector<5x8xf32>, vector<5x8xf32>, vector<5x5xf32> -> vector<5x5xf32>
    %232 = vector.extract_strided_slice %211 {offsets = [5, 16], sizes = [5, 8], strides = [1, 1]} : vector<10x32xf32> to vector<5x8xf32>
    %233 = vector.extract_strided_slice %212 {offsets = [5, 16], sizes = [5, 8], strides = [1, 1]} : vector<10x32xf32> to vector<5x8xf32>
    %cst_100 = arith.constant dense<0.000000e+00> : vector<5x5xf32>
    %234 = tpu.matmul %232, %233, %cst_100 {dimension_numbers = #tpu.dot_dimension_numbers<[1], [1], [0], [0], [0, 0, 1, 0], [], []>} : vector<5x8xf32>, vector<5x8xf32>, vector<5x5xf32> -> vector<5x5xf32>
    %235 = vector.extract_strided_slice %211 {offsets = [5, 24], sizes = [5, 8], strides = [1, 1]} : vector<10x32xf32> to vector<5x8xf32>
    %236 = vector.extract_strided_slice %212 {offsets = [5, 24], sizes = [5, 8], strides = [1, 1]} : vector<10x32xf32> to vector<5x8xf32>
    %cst_101 = arith.constant dense<0.000000e+00> : vector<5x5xf32>
    %237 = tpu.matmul %235, %236, %cst_101 {dimension_numbers = #tpu.dot_dimension_numbers<[1], [1], [0], [0], [0, 0, 1, 0], [], []>} : vector<5x8xf32>, vector<5x8xf32>, vector<5x5xf32> -> vector<5x5xf32>
    %238 = tpu.concatenate %216, %219, %222, %225, %228, %231, %234, %237 in 0 : vector<5x5xf32>, vector<5x5xf32>, vector<5x5xf32>, vector<5x5xf32>, vector<5x5xf32>, vector<5x5xf32>, vector<5x5xf32>, vector<5x5xf32> -> vector<40x5xf32>
    %cst_102 = arith.constant dense<0xFF800000> : vector<40xf32>
    %239 = vector.multi_reduction <maximumf>, %238, %cst_102 [1] : vector<40x5xf32> to vector<40xf32>
    %240 = vector.shape_cast %239 : vector<40xf32> to vector<40x1xf32>
    %241 = vector.broadcast %240 : vector<40x1xf32> to vector<40x5xf32>
    %242 = arith.subf %238, %241 : vector<40x5xf32>
    %243 = math.exp %242 : vector<40x5xf32>
    %cst_103 = arith.constant dense<0.000000e+00> : vector<40xf32>
    %244 = vector.multi_reduction <add>, %243, %cst_103 [1] : vector<40x5xf32> to vector<40xf32>
    %245 = vector.shape_cast %244 : vector<40xf32> to vector<40x1xf32>
    %246 = tpu.reciprocal %245 {approx = true} : vector<40x1xf32> -> vector<40x1xf32>
    %247 = vector.broadcast %246 : vector<40x1xf32> to vector<40x5xf32>
    %248 = arith.mulf %243, %247 : vector<40x5xf32>
    %249 = vector.extract_strided_slice %248 {offsets = [0, 0], sizes = [5, 5], strides = [1, 1]} : vector<40x5xf32> to vector<5x5xf32>
    %250 = vector.extract_strided_slice %213 {offsets = [0, 0], sizes = [5, 8], strides = [1, 1]} : vector<10x32xf32> to vector<5x8xf32>
    %cst_104 = arith.constant dense<0.000000e+00> : vector<5x8xf32>
    %251 = tpu.matmul %249, %250, %cst_104 {dimension_numbers = #tpu.dot_dimension_numbers<[1], [0], [0], [1], [0, 0, 1, 1], [], []>} : vector<5x5xf32>, vector<5x8xf32>, vector<5x8xf32> -> vector<5x8xf32>
    %252 = vector.extract_strided_slice %248 {offsets = [5, 0], sizes = [5, 5], strides = [1, 1]} : vector<40x5xf32> to vector<5x5xf32>
    %253 = vector.extract_strided_slice %213 {offsets = [0, 8], sizes = [5, 8], strides = [1, 1]} : vector<10x32xf32> to vector<5x8xf32>
    %cst_105 = arith.constant dense<0.000000e+00> : vector<5x8xf32>
    %254 = tpu.matmul %252, %253, %cst_105 {dimension_numbers = #tpu.dot_dimension_numbers<[1], [0], [0], [1], [0, 0, 1, 1], [], []>} : vector<5x5xf32>, vector<5x8xf32>, vector<5x8xf32> -> vector<5x8xf32>
    %255 = vector.extract_strided_slice %248 {offsets = [10, 0], sizes = [5, 5], strides = [1, 1]} : vector<40x5xf32> to vector<5x5xf32>
    %256 = vector.extract_strided_slice %213 {offsets = [0, 16], sizes = [5, 8], strides = [1, 1]} : vector<10x32xf32> to vector<5x8xf32>
    %cst_106 = arith.constant dense<0.000000e+00> : vector<5x8xf32>
    %257 = tpu.matmul %255, %256, %cst_106 {dimension_numbers = #tpu.dot_dimension_numbers<[1], [0], [0], [1], [0, 0, 1, 1], [], []>} : vector<5x5xf32>, vector<5x8xf32>, vector<5x8xf32> -> vector<5x8xf32>
    %258 = vector.extract_strided_slice %248 {offsets = [15, 0], sizes = [5, 5], strides = [1, 1]} : vector<40x5xf32> to vector<5x5xf32>
    %259 = vector.extract_strided_slice %213 {offsets = [0, 24], sizes = [5, 8], strides = [1, 1]} : vector<10x32xf32> to vector<5x8xf32>
    %cst_107 = arith.constant dense<0.000000e+00> : vector<5x8xf32>
    %260 = tpu.matmul %258, %259, %cst_107 {dimension_numbers = #tpu.dot_dimension_numbers<[1], [0], [0], [1], [0, 0, 1, 1], [], []>} : vector<5x5xf32>, vector<5x8xf32>, vector<5x8xf32> -> vector<5x8xf32>
    %261 = tpu.concatenate %251, %254, %257, %260 in 1 : vector<5x8xf32>, vector<5x8xf32>, vector<5x8xf32>, vector<5x8xf32> -> vector<5x32xf32>
    %262 = vector.extract_strided_slice %248 {offsets = [20, 0], sizes = [5, 5], strides = [1, 1]} : vector<40x5xf32> to vector<5x5xf32>
    %263 = vector.extract_strided_slice %213 {offsets = [5, 0], sizes = [5, 8], strides = [1, 1]} : vector<10x32xf32> to vector<5x8xf32>
    %cst_108 = arith.constant dense<0.000000e+00> : vector<5x8xf32>
    %264 = tpu.matmul %262, %263, %cst_108 {dimension_numbers = #tpu.dot_dimension_numbers<[1], [0], [0], [1], [0, 0, 1, 1], [], []>} : vector<5x5xf32>, vector<5x8xf32>, vector<5x8xf32> -> vector<5x8xf32>
    %265 = vector.extract_strided_slice %248 {offsets = [25, 0], sizes = [5, 5], strides = [1, 1]} : vector<40x5xf32> to vector<5x5xf32>
    %266 = vector.extract_strided_slice %213 {offsets = [5, 8], sizes = [5, 8], strides = [1, 1]} : vector<10x32xf32> to vector<5x8xf32>
    %cst_109 = arith.constant dense<0.000000e+00> : vector<5x8xf32>
    %267 = tpu.matmul %265, %266, %cst_109 {dimension_numbers = #tpu.dot_dimension_numbers<[1], [0], [0], [1], [0, 0, 1, 1], [], []>} : vector<5x5xf32>, vector<5x8xf32>, vector<5x8xf32> -> vector<5x8xf32>
    %268 = vector.extract_strided_slice %248 {offsets = [30, 0], sizes = [5, 5], strides = [1, 1]} : vector<40x5xf32> to vector<5x5xf32>
    %269 = vector.extract_strided_slice %213 {offsets = [5, 16], sizes = [5, 8], strides = [1, 1]} : vector<10x32xf32> to vector<5x8xf32>
    %cst_110 = arith.constant dense<0.000000e+00> : vector<5x8xf32>
    %270 = tpu.matmul %268, %269, %cst_110 {dimension_numbers = #tpu.dot_dimension_numbers<[1], [0], [0], [1], [0, 0, 1, 1], [], []>} : vector<5x5xf32>, vector<5x8xf32>, vector<5x8xf32> -> vector<5x8xf32>
    %271 = vector.extract_strided_slice %248 {offsets = [35, 0], sizes = [5, 5], strides = [1, 1]} : vector<40x5xf32> to vector<5x5xf32>
    %272 = vector.extract_strided_slice %213 {offsets = [5, 24], sizes = [5, 8], strides = [1, 1]} : vector<10x32xf32> to vector<5x8xf32>
    %cst_111 = arith.constant dense<0.000000e+00> : vector<5x8xf32>
    %273 = tpu.matmul %271, %272, %cst_111 {dimension_numbers = #tpu.dot_dimension_numbers<[1], [0], [0], [1], [0, 0, 1, 1], [], []>} : vector<5x5xf32>, vector<5x8xf32>, vector<5x8xf32> -> vector<5x8xf32>
    %274 = tpu.concatenate %264, %267, %270, %273 in 1 : vector<5x8xf32>, vector<5x8xf32>, vector<5x8xf32>, vector<5x8xf32> -> vector<5x32xf32>
    %275 = tpu.concatenate %261, %274 in 0 : vector<5x32xf32>, vector<5x32xf32> -> vector<10x32xf32>
    %276 = arith.truncf %275 : vector<10x32xf32> to vector<10x32xbf16>
    %c1_112 = arith.constant 1 : index
    %c0_113 = arith.constant 0 : index
    %c0_114 = arith.constant 0 : index
    %277 = vector.load %arg8[%c1_112, %c0_113, %c0_114] : memref<2x32x32xbf16, #tpu.memory_space<vmem>>, vector<1x32x32xbf16>
    %278 = vector.shape_cast %277 : vector<1x32x32xbf16> to vector<32x32xbf16>
    %cst_115 = arith.constant dense<0.000000e+00> : vector<10x32xf32>
    %279 = tpu.matmul %276, %278, %cst_115 {dimension_numbers = #tpu.dot_dimension_numbers<[1], [0], [0], [1], [0, 0, 1, 1], [], []>} : vector<10x32xbf16>, vector<32x32xbf16>, vector<10x32xf32> -> vector<10x32xf32>
    %280 = arith.addf %176, %279 : vector<10x32xf32>
    %c1_116 = arith.constant 1 : index
    %c0_117 = arith.constant 0 : index
    %c0_118 = arith.constant 0 : index
    %281 = vector.load %arg9[%c1_116, %c0_117, %c0_118] : memref<2x1x32xf32, #tpu.memory_space<vmem>>, vector<1x1x32xf32>
    %282 = vector.shape_cast %281 : vector<1x1x32xf32> to vector<1x32xf32>
    %283 = vector.broadcast %282 : vector<1x32xf32> to vector<10x32xf32>
    %284 = arith.addf %280, %283 : vector<10x32xf32>
    %c1_119 = arith.constant 1 : index
    %c0_120 = arith.constant 0 : index
    %c0_121 = arith.constant 0 : index
    %285 = vector.load %arg10[%c1_119, %c0_120, %c0_121] : memref<2x1x32xf32, #tpu.memory_space<vmem>>, vector<1x1x32xf32>
    %286 = vector.shape_cast %285 : vector<1x1x32xf32> to vector<1x32xf32>
    %c1_122 = arith.constant 1 : index
    %c0_123 = arith.constant 0 : index
    %c0_124 = arith.constant 0 : index
    %287 = vector.load %arg11[%c1_122, %c0_123, %c0_124] : memref<2x1x32xf32, #tpu.memory_space<vmem>>, vector<1x1x32xf32>
    %288 = vector.shape_cast %287 : vector<1x1x32xf32> to vector<1x32xf32>
    %cst_125 = arith.constant dense<0.000000e+00> : vector<10xf32>
    %289 = vector.multi_reduction <add>, %284, %cst_125 [1] : vector<10x32xf32> to vector<10xf32>
    %290 = vector.shape_cast %289 : vector<10xf32> to vector<10x1xf32>
    %cst_126 = arith.constant 3.200000e+01 : f32
    %291 = vector.broadcast %cst_126 : f32 to vector<10x1xf32>
    %292 = arith.divf %290, %291 : vector<10x1xf32>
    %293 = vector.broadcast %292 : vector<10x1xf32> to vector<10x32xf32>
    %294 = arith.subf %284, %293 : vector<10x32xf32>
    %295 = arith.mulf %294, %294 : vector<10x32xf32>
    %cst_127 = arith.constant dense<0.000000e+00> : vector<10xf32>
    %296 = vector.multi_reduction <add>, %295, %cst_127 [1] : vector<10x32xf32> to vector<10xf32>
    %297 = vector.shape_cast %296 : vector<10xf32> to vector<10x1xf32>
    %cst_128 = arith.constant 3.200000e+01 : f32
    %298 = vector.broadcast %cst_128 : f32 to vector<10x1xf32>
    %299 = arith.divf %297, %298 : vector<10x1xf32>
    %300 = vector.broadcast %292 : vector<10x1xf32> to vector<10x32xf32>
    %301 = arith.subf %284, %300 : vector<10x32xf32>
    %cst_129 = arith.constant 9.99999997E-7 : f32
    %302 = vector.broadcast %cst_129 : f32 to vector<10x1xf32>
    %303 = arith.addf %299, %302 : vector<10x1xf32>
    %304 = math.rsqrt %303 : vector<10x1xf32>
    %305 = vector.broadcast %304 : vector<10x1xf32> to vector<10x32xf32>
    %306 = arith.mulf %301, %305 : vector<10x32xf32>
    %307 = vector.broadcast %286 : vector<1x32xf32> to vector<10x32xf32>
    %308 = arith.mulf %306, %307 : vector<10x32xf32>
    %309 = vector.broadcast %288 : vector<1x32xf32> to vector<10x32xf32>
    %310 = arith.addf %308, %309 : vector<10x32xf32>
    %311 = arith.truncf %310 : vector<10x32xf32> to vector<10x32xbf16>
    %c1_130 = arith.constant 1 : index
    %c0_131 = arith.constant 0 : index
    %c0_132 = arith.constant 0 : index
    %312 = vector.load %arg12[%c1_130, %c0_131, %c0_132] : memref<2x32x64xbf16, #tpu.memory_space<vmem>>, vector<1x32x64xbf16>
    %313 = vector.shape_cast %312 : vector<1x32x64xbf16> to vector<32x64xbf16>
    %cst_133 = arith.constant dense<0.000000e+00> : vector<10x64xf32>
    %314 = tpu.matmul %311, %313, %cst_133 {dimension_numbers = #tpu.dot_dimension_numbers<[1], [0], [0], [1], [0, 0, 1, 1], [], []>} : vector<10x32xbf16>, vector<32x64xbf16>, vector<10x64xf32> -> vector<10x64xf32>
    %c1_134 = arith.constant 1 : index
    %c0_135 = arith.constant 0 : index
    %c0_136 = arith.constant 0 : index
    %315 = vector.load %arg13[%c1_134, %c0_135, %c0_136] : memref<2x1x64xf32, #tpu.memory_space<vmem>>, vector<1x1x64xf32>
    %316 = vector.shape_cast %315 : vector<1x1x64xf32> to vector<1x64xf32>
    %317 = vector.broadcast %316 : vector<1x64xf32> to vector<10x64xf32>
    %318 = arith.addf %314, %317 : vector<10x64xf32>
    %319 = arith.mulf %318, %318 : vector<10x64xf32>
    %320 = arith.mulf %318, %319 : vector<10x64xf32>
    %cst_137 = arith.constant 4.471500e-02 : f32
    %321 = vector.broadcast %cst_137 : f32 to vector<10x64xf32>
    %322 = arith.mulf %321, %320 : vector<10x64xf32>
    %323 = arith.addf %318, %322 : vector<10x64xf32>
    %cst_138 = arith.constant 0.797884583 : f32
    %324 = vector.broadcast %cst_138 : f32 to vector<10x64xf32>
    %325 = arith.mulf %324, %323 : vector<10x64xf32>
    %326 = math.tanh %325 : vector<10x64xf32>
    %cst_139 = arith.constant 1.000000e+00 : f32
    %327 = vector.broadcast %cst_139 : f32 to vector<10x64xf32>
    %328 = arith.addf %327, %326 : vector<10x64xf32>
    %cst_140 = arith.constant 5.000000e-01 : f32
    %329 = vector.broadcast %cst_140 : f32 to vector<10x64xf32>
    %330 = arith.mulf %329, %328 : vector<10x64xf32>
    %331 = arith.mulf %318, %330 : vector<10x64xf32>
    %332 = arith.truncf %331 : vector<10x64xf32> to vector<10x64xbf16>
    %c1_141 = arith.constant 1 : index
    %c0_142 = arith.constant 0 : index
    %c0_143 = arith.constant 0 : index
    %333 = vector.load %arg14[%c1_141, %c0_142, %c0_143] : memref<2x64x32xbf16, #tpu.memory_space<vmem>>, vector<1x64x32xbf16>
    %334 = vector.shape_cast %333 : vector<1x64x32xbf16> to vector<64x32xbf16>
    %cst_144 = arith.constant dense<0.000000e+00> : vector<10x32xf32>
    %335 = tpu.matmul %332, %334, %cst_144 {dimension_numbers = #tpu.dot_dimension_numbers<[1], [0], [0], [1], [0, 0, 1, 1], [], []>} : vector<10x64xbf16>, vector<64x32xbf16>, vector<10x32xf32> -> vector<10x32xf32>
    %c1_145 = arith.constant 1 : index
    %c0_146 = arith.constant 0 : index
    %c0_147 = arith.constant 0 : index
    %336 = vector.load %arg15[%c1_145, %c0_146, %c0_147] : memref<2x1x32xf32, #tpu.memory_space<vmem>>, vector<1x1x32xf32>
    %337 = vector.shape_cast %336 : vector<1x1x32xf32> to vector<1x32xf32>
    %338 = vector.broadcast %337 : vector<1x32xf32> to vector<10x32xf32>
    %339 = arith.addf %335, %338 : vector<10x32xf32>
    %340 = arith.addf %284, %339 : vector<10x32xf32>
    %341 = vector.extract_strided_slice %340 {offsets = [0, 0], sizes = [1, 32], strides = [1, 1]} : vector<10x32xf32> to vector<1x32xf32>
    %342 = vector.extract_strided_slice %340 {offsets = [5, 0], sizes = [1, 32], strides = [1, 1]} : vector<10x32xf32> to vector<1x32xf32>
    %343 = tpu.concatenate %341, %342 in 0 : vector<1x32xf32>, vector<1x32xf32> -> vector<2x32xf32>
    %c0_148 = arith.constant 0 : index
    %c0_149 = arith.constant 0 : index
    %344 = vector.load %arg16[%c0_148, %c0_149] : memref<1x32xf32, #tpu.memory_space<vmem>>, vector<1x32xf32>
    %c0_150 = arith.constant 0 : index
    %c0_151 = arith.constant 0 : index
    %345 = vector.load %arg17[%c0_150, %c0_151] : memref<1x32xf32, #tpu.memory_space<vmem>>, vector<1x32xf32>
    %cst_152 = arith.constant dense<0.000000e+00> : vector<2xf32>
    %346 = vector.multi_reduction <add>, %343, %cst_152 [1] : vector<2x32xf32> to vector<2xf32>
    %347 = vector.shape_cast %346 : vector<2xf32> to vector<2x1xf32>
    %cst_153 = arith.constant 3.200000e+01 : f32
    %348 = vector.broadcast %cst_153 : f32 to vector<2x1xf32>
    %349 = arith.divf %347, %348 : vector<2x1xf32>
    %350 = vector.broadcast %349 : vector<2x1xf32> to vector<2x32xf32>
    %351 = arith.subf %343, %350 : vector<2x32xf32>
    %352 = arith.mulf %351, %351 : vector<2x32xf32>
    %cst_154 = arith.constant dense<0.000000e+00> : vector<2xf32>
    %353 = vector.multi_reduction <add>, %352, %cst_154 [1] : vector<2x32xf32> to vector<2xf32>
    %354 = vector.shape_cast %353 : vector<2xf32> to vector<2x1xf32>
    %cst_155 = arith.constant 3.200000e+01 : f32
    %355 = vector.broadcast %cst_155 : f32 to vector<2x1xf32>
    %356 = arith.divf %354, %355 : vector<2x1xf32>
    %357 = vector.broadcast %349 : vector<2x1xf32> to vector<2x32xf32>
    %358 = arith.subf %343, %357 : vector<2x32xf32>
    %cst_156 = arith.constant 9.99999997E-7 : f32
    %359 = vector.broadcast %cst_156 : f32 to vector<2x1xf32>
    %360 = arith.addf %356, %359 : vector<2x1xf32>
    %361 = math.rsqrt %360 : vector<2x1xf32>
    %362 = vector.broadcast %361 : vector<2x1xf32> to vector<2x32xf32>
    %363 = arith.mulf %358, %362 : vector<2x32xf32>
    %364 = vector.broadcast %344 : vector<1x32xf32> to vector<2x32xf32>
    %365 = arith.mulf %363, %364 : vector<2x32xf32>
    %366 = vector.broadcast %345 : vector<1x32xf32> to vector<2x32xf32>
    %367 = arith.addf %365, %366 : vector<2x32xf32>
    %c0_157 = arith.constant 0 : index
    %c0_158 = arith.constant 0 : index
    %368 = vector.load %arg18[%c0_157, %c0_158] : memref<2x32xf32, #tpu.memory_space<vmem>>, vector<2x32xf32>
    tpu.vector_store %arg18[%c0_157, %c0_158], %367 {strides = array<i32>} : memref<2x32xf32, #tpu.memory_space<vmem>>, vector<2x32xf32>,
    return
  }
  func.func @transform_0(%arg0: i32) -> (i32, i32) {
    %c0_i32 = arith.constant 0 : i32
    %c0_i32_0 = arith.constant 0 : i32
    %c0_i32_1 = arith.constant 0 : i32
    return %c0_i32, %c0_i32_0 : i32, i32
  }
  func.func @transform_1(%arg0: i32) -> (i32, i32) {
    %c0_i32 = arith.constant 0 : i32
    %c0_i32_0 = arith.constant 0 : i32
    %c0_i32_1 = arith.constant 0 : i32
    return %c0_i32, %c0_i32_0 : i32, i32
  }
  func.func @transform_2(%arg0: i32) -> (i32, i32) {
    %c0_i32 = arith.constant 0 : i32
    %c0_i32_0 = arith.constant 0 : i32
    %c0_i32_1 = arith.constant 0 : i32
    return %c0_i32, %c0_i32_0 : i32, i32
  }
  func.func @transform_3(%arg0: i32) -> (i32, i32, i32) {
    %c0_i32 = arith.constant 0 : i32
    %c0_i32_0 = arith.constant 0 : i32
    %c0_i32_1 = arith.constant 0 : i32
    %c0_i32_2 = arith.constant 0 : i32
    return %c0_i32, %c0_i32_0, %c0_i32_1 : i32, i32, i32
  }
  func.func @transform_4(%arg0: i32) -> (i32, i32, i32) {
    %c0_i32 = arith.constant 0 : i32
    %c0_i32_0 = arith.constant 0 : i32
    %c0_i32_1 = arith.constant 0 : i32
    %c0_i32_2 = arith.constant 0 : i32
    return %c0_i32, %c0_i32_0, %c0_i32_1 : i32, i32, i32
  }
  func.func @transform_5(%arg0: i32) -> (i32, i32, i32) {
    %c0_i32 = arith.constant 0 : i32
    %c0_i32_0 = arith.constant 0 : i32
    %c0_i32_1 = arith.constant 0 : i32
    %c0_i32_2 = arith.constant 0 : i32
    return %c0_i32, %c0_i32_0, %c0_i32_1 : i32, i32, i32
  }
  func.func @transform_6(%arg0: i32) -> (i32, i32, i32) {
    %c0_i32 = arith.constant 0 : i32
    %c0_i32_0 = arith.constant 0 : i32
    %c0_i32_1 = arith.constant 0 : i32
    %c0_i32_2 = arith.constant 0 : i32
    return %c0_i32, %c0_i32_0, %c0_i32_1 : i32, i32, i32
  }
  func.func @transform_7(%arg0: i32) -> (i32, i32, i32) {
    %c0_i32 = arith.constant 0 : i32
    %c0_i32_0 = arith.constant 0 : i32
    %c0_i32_1 = arith.constant 0 : i32
    %c0_i32_2 = arith.constant 0 : i32
    return %c0_i32, %c0_i32_0, %c0_i32_1 : i32, i32, i32
  }
  func.func @transform_8(%arg0: i32) -> (i32, i32, i32) {
    %c0_i32 = arith.constant 0 : i32
    %c0_i32_0 = arith.constant 0 : i32
    %c0_i32_1 = arith.constant 0 : i32
    %c0_i32_2 = arith.constant 0 : i32
    return %c0_i32, %c0_i32_0, %c0_i32_1 : i32, i32, i32
  }
  func.func @transform_9(%arg0: i32) -> (i32, i32, i32) {
    %c0_i32 = arith.constant 0 : i32
    %c0_i32_0 = arith.constant 0 : i32
    %c0_i32_1 = arith.constant 0 : i32
    %c0_i32_2 = arith.constant 0 : i32
    return %c0_i32, %c0_i32_0, %c0_i32_1 : i32, i32, i32
  }
  func.func @transform_10(%arg0: i32) -> (i32, i32, i32) {
    %c0_i32 = arith.constant 0 : i32
    %c0_i32_0 = arith.constant 0 : i32
    %c0_i32_1 = arith.constant 0 : i32
    %c0_i32_2 = arith.constant 0 : i32
    return %c0_i32, %c0_i32_0, %c0_i32_1 : i32, i32, i32
  }
  func.func @transform_11(%arg0: i32) -> (i32, i32, i32) {
    %c0_i32 = arith.constant 0 : i32
    %c0_i32_0 = arith.constant 0 : i32
    %c0_i32_1 = arith.constant 0 : i32
    %c0_i32_2 = arith.constant 0 : i32
    return %c0_i32, %c0_i32_0, %c0_i32_1 : i32, i32, i32
  }
  func.func @transform_12(%arg0: i32) -> (i32, i32, i32) {
    %c0_i32 = arith.constant 0 : i32
    %c0_i32_0 = arith.constant 0 : i32
    %c0_i32_1 = arith.constant 0 : i32
    %c0_i32_2 = arith.constant 0 : i32
    return %c0_i32, %c0_i32_0, %c0_i32_1 : i32, i32, i32
  }
  func.func @transform_13(%arg0: i32) -> (i32, i32, i32) {
    %c0_i32 = arith.constant 0 : i32
    %c0_i32_0 = arith.constant 0 : i32
    %c0_i32_1 = arith.constant 0 : i32
    %c0_i32_2 = arith.constant 0 : i32
    return %c0_i32, %c0_i32_0, %c0_i32_1 : i32, i32, i32
  }
  func.func @transform_14(%arg0: i32) -> (i32, i32, i32) {
    %c0_i32 = arith.constant 0 : i32
    %c0_i32_0 = arith.constant 0 : i32
    %c0_i32_1 = arith.constant 0 : i32
    %c0_i32_2 = arith.constant 0 : i32
    return %c0_i32, %c0_i32_0, %c0_i32_1 : i32, i32, i32
  }
  func.func @transform_15(%arg0: i32) -> (i32, i32) {
    %c0_i32 = arith.constant 0 : i32
    %c0_i32_0 = arith.constant 0 : i32
    %c0_i32_1 = arith.constant 0 : i32
    return %c0_i32, %c0_i32_0 : i32, i32
  }
  func.func @transform_16(%arg0: i32) -> (i32, i32) {
    %c0_i32 = arith.constant 0 : i32
    %c0_i32_0 = arith.constant 0 : i32
    %c0_i32_1 = arith.constant 0 : i32
    return %c0_i32, %c0_i32_0 : i32, i32
  }
  func.func @transform_17(%arg0: i32) -> (i32, i32) {
    %c0_i32 = arith.constant 0 : i32
    %c0_i32_0 = arith.constant 0 : i32
    %c0_i32_1 = arith.constant 0 : i32
    return %c0_i32, %c0_i32_0 : i32, i32
  }
}

</mosaic_0001>

<bundles_post_ra>
// kernel: vit_b16_image_embedd.1
= control target key start
LH: loop header
LB: loop body
LE: loop exit
PB: predicated region body
PF: predicated region fallthrough
CT: control target
= control target key end

     0   :  { %s6105_s0 = inlined_call_operand.vmem [shape: bf16[8,1024], index: 0, kind: input, shape index: {}]   ;;  %s6106_s1 = inlined_call_operand.vmem [shape: f32[5,32], index: 1, kind: input, shape index: {}]   ;;  %s6107_s2 = inlined_call_operand.vmem [shape: bf16[1024,32], index: 2, kind: input, shape index: {}]   ;;  %s6108_s3 = inlined_call_operand.vmem [shape: f32[2,1,32], index: 3, kind: input, shape index: {}]   ;;  %s6109_s4 = inlined_call_operand.vmem [shape: f32[2,1,32], index: 4, kind: input, shape index: {}]   ;;  %s6110_s5 = inlined_call_operand.vmem [shape: bf16[2,32,96], index: 5, kind: input, shape index: {}]   ;;  %s6111_s6 = inlined_call_operand.vmem [shape: f32[2,1,32], index: 6, kind: input, shape index: {}]   ;;  %s6112_s7 = inlined_call_operand.vmem [shape: bf16[2,32,32], index: 7, kind: input, shape index: {}]   ;;  %s6113_s8 = inlined_call_operand.vmem [shape: f32[2,1,32], index: 8, kind: input, shape index: {}]   ;;  %s6114_s9 = inlined_call_operand.vmem [shape: f32[2,1,32], index: 9, kind: input, shape index: {}]   ;;  %s6115_s10 = inlined_call_operand.vmem [shape: f32[2,1,32], index: 10, kind: input, shape index: {}]   ;;  %s6116_s11 = inlined_call_operand.vmem [shape: bf16[2,32,64], index: 11, kind: input, shape index: {}]   ;;  %s6117_s12 = inlined_call_operand.vmem [shape: f32[2,1,64], index: 12, kind: input, shape index: {}]   ;;  %s6118_s13 = inlined_call_operand.vmem [shape: bf16[2,64,32], index: 13, kind: input, shape index: {}]   ;;  %s6119_s14 = inlined_call_operand.vmem [shape: f32[2,1,32], index: 14, kind: input, shape index: {}]   ;;  %s6120_s15 = inlined_call_operand.vmem [shape: f32[1,32], index: 15, kind: input, shape index: {}]   ;;  %s6121_s16 = inlined_call_operand.vmem [shape: f32[1,32], index: 16, kind: input, shape index: {}]   ;;  %s6122_s17 = inlined_call_operand.hbm [shape: f32[2,32], index: 17, kind: output, shape index: {}]  }
   0x1   :  { %6132 = sst [smem:[#allocation5_spill]] %s6105_s0 }
   0x2   :  { %6133 = sst [smem:[#allocation6_spill]] %s6106_s1 }
   0x3   :  { %v5067_v0 = vld [vmem:[%s6107_s2 + $0x78] sm:$0xff]   ;;  %v5071_v4 = vld [vmem:[%s6107_s2 + $0x70] sm:$0xff]   ;;  %v5075_v8 = vld [vmem:[%s6107_s2 + $0x68] sm:$0xff]   ;;  %s6134_s0 = sld [smem:[#allocation5_spill]] }
   0x4   :  { %v5068_v1 = vld [vmem:[%s6107_s2 + $0xf8] sm:$0xff]   ;;  %4618 = vmatprep.subr.bf16.mxu0 %v5067_v0  ;;  %v5072_v5 = vld [vmem:[%s6107_s2 + $0xf0] sm:$0xff]   ;;  %v5076_v9 = vld [vmem:[%s6107_s2 + $0xe8] sm:$0xff]  }
   0x5   :  { %v5069_v2 = vld [vmem:[%s6107_s2 + $0x38] sm:$0xff]   ;;  %4640 = vmatprep.subr.bf16.mxu1 %v5068_v1  ;;  %v5073_v6 = vld [vmem:[%s6107_s2 + $0x30] sm:$0xff]   ;;  %v5077_v10 = vld [vmem:[%s6107_s2 + $0x28] sm:$0xff]  }
   0x6   :  { %v5070_v3 = vld [vmem:[%s6107_s2 + $0xb8] sm:$0xff]   ;;  %4619 = vmatpush3.bf16.msra.mxu0 %v5069_v2  ;;  %v5074_v7 = vld [vmem:[%s6107_s2 + $0xb0] sm:$0xff]   ;;  %v5078_v11 = vld [vmem:[%s6107_s2 + $0xa8] sm:$0xff]  }
   0x7   :  { %4641 = vmatpush3.bf16.msra.mxu1 %v5070_v3  ;;  %4620 = vmatprep.subr.bf16.mxu0 %v5071_v4  ;;  %v5079_v12 = vld [vmem:[%s6107_s2 + $0x60] sm:$0xff]   ;;  %v5083_v16 = vld [vmem:[%s6107_s2 + $0x58] sm:$0xff]   ;;  %v5087_v20 = vld [vmem:[%s6107_s2 + $0x50] sm:$0xff]  }
   0x8   :  { %4642 = vmatprep.subr.bf16.mxu1 %v5072_v5  ;;  %v5080_v13 = vld [vmem:[%s6107_s2 + $0xe0] sm:$0xff]   ;;  %v5084_v17 = vld [vmem:[%s6107_s2 + $0xd8] sm:$0xff]   ;;  %v5088_v21 = vld [vmem:[%s6107_s2 + $0xd0] sm:$0xff]  }
   0x9   :  { %v5081_v14 = vld [vmem:[%s6107_s2 + $0x20] sm:$0xff]   ;;  %v5085_v18 = vld [vmem:[%s6107_s2 + $0x18] sm:$0xff]   ;;  %v5089_v22 = vld [vmem:[%s6107_s2 + $0x10] sm:$0xff]  }
   0xa   :  { %4621 = vmatpush3.bf16.msra.mxu0 %v5073_v6  ;;  %v5082_v15 = vld [vmem:[%s6107_s2 + $0xa0] sm:$0xff]   ;;  %v5086_v19 = vld [vmem:[%s6107_s2 + $0x98] sm:$0xff]   ;;  %v5090_v23 = vld [vmem:[%s6107_s2 + $0x90] sm:$0xff]  }
   0xb   :  { %4643 = vmatpush3.bf16.msra.mxu1 %v5074_v7  ;;  %4622 = vmatprep.subr.bf16.mxu0 %v5075_v8  ;;  %v5091_v24 = vld [vmem:[%s6107_s2 + $0x48] sm:$0xff]   ;;  %v5095_v28 = vld [vmem:[%s6107_s2 + $0x40] sm:$0xff]   ;;  %v5103_v38 = vld [vmem:[%s6107_s2 + $0x178] sm:$0xff]  }
   0xc   :  { %4644 = vmatprep.subr.bf16.mxu1 %v5076_v9  ;;  %v5092_v25 = vld [vmem:[%s6107_s2 + $0xc8] sm:$0xff]   ;;  %v5096_v29 = vld [vmem:[%s6107_s2 + $0xc0] sm:$0xff]   ;;  %v5104_v39 = vld [vmem:[%s6107_s2 + $0x1f8] sm:$0xff]  }
   0xd   :  { %v5093_v26 = vld [vmem:[%s6107_s2 + $0x8] sm:$0xff]   ;;  %v5097_v30 = vld [vmem:[%s6107_s2] sm:$0xff]   ;;  %v5105_v40 = vld [vmem:[%s6107_s2 + $0x138] sm:$0xff]  }
   0xe   :  { %4623 = vmatpush3.bf16.msra.mxu0 %v5077_v10  ;;  %v5094_v27 = vld [vmem:[%s6107_s2 + $0x88] sm:$0xff]   ;;  %v5098_v31 = vld [vmem:[%s6107_s2 + $0x80] sm:$0xff]   ;;  %v5106_v41 = vld [vmem:[%s6107_s2 + $0x1b8] sm:$0xff]  }
   0xf   :  { %4645 = vmatpush3.bf16.msra.mxu1 %v5078_v11  ;;  %4624 = vmatprep.subr.bf16.mxu0 %v5079_v12  ;;  %v58_v32 = vld [vmem:[%s6134_s0] sm:$0xff]  ;;  %v59_v33 = vld [vmem:[%s6134_s0 + $0x8] sm:$0xff]  ;;  %v5107_v42 = vld [vmem:[%s6107_s2 + $0x170] sm:$0xff]  }
  0x10   :  { %4646 = vmatprep.subr.bf16.mxu1 %v5080_v13  ;;  %v4408_v34 = vcombine.low %v58_v32, %v58_v32  ;;  %v4409_v35 = vcombine.high %v58_v32, %v58_v32  ;;  %v4410_v36 = vcombine.low %v59_v33, %v59_v33  ;;  %v4411_v37 = vcombine.high %v59_v33, %v59_v33  ;;  %v5108_v43 = vld [vmem:[%s6107_s2 + $0x1f0] sm:$0xff]   ;;  %v5111_v46 = vld [vmem:[%s6107_s2 + $0x168] sm:$0xff]   ;;  %v5115_v50 = vld [vmem:[%s6107_s2 + $0x160] sm:$0xff]  }
  0x11   :  { %v5109_v44 = vld [vmem:[%s6107_s2 + $0x130] sm:$0xff]   ;;  %v5112_v47 = vld [vmem:[%s6107_s2 + $0x1e8] sm:$0xff]   ;;  %v5116_v51 = vld [vmem:[%s6107_s2 + $0x1e0] sm:$0xff]  }
  0x12   :  { %4625 = vmatpush3.bf16.msra.mxu0 %v5081_v14  ;;  %634 = vmatprep.mubr.bf16.mxu0 %v4409_v35  ;;  %v5110_v45 = vld [vmem:[%s6107_s2 + $0x1b0] sm:$0xff]   ;;  %v5113_v48 = vld [vmem:[%s6107_s2 + $0x128] sm:$0xff]   ;;  %v5117_v52 = vld [vmem:[%s6107_s2 + $0x120] sm:$0xff]  }
  0x13   :  { %4647 = vmatpush3.bf16.msra.mxu1 %v5082_v15  ;;  %4626 = vmatprep.subr.bf16.mxu0 %v5083_v16  ;;  %v5114_v49 = vld [vmem:[%s6107_s2 + $0x1a8] sm:$0xff]   ;;  %v5118_v53 = vld [vmem:[%s6107_s2 + $0x1a0] sm:$0xff]   ;;  %v5119_v54 = vld [vmem:[%s6107_s2 + $0x158] sm:$0xff]  }
  0x14   :  { %4648 = vmatprep.subr.bf16.mxu1 %v5084_v17  ;;  %674 = vmatprep.mubr.bf16.mxu1 %v4411_v37  ;;  %v5120_v55 = vld [vmem:[%s6107_s2 + $0x1d8] sm:$0xff]   ;;  %v5123_v58 = vld [vmem:[%s6107_s2 + $0x150] sm:$0xff]   ;;  %v5127_v62 = vld [vmem:[%s6107_s2 + $0x148] sm:$0xff]  }
  0x15   :  { %v5121_v56 = vld [vmem:[%s6107_s2 + $0x118] sm:$0xff]   ;;  %v5124_v59 = vld [vmem:[%s6107_s2 + $0x1d0] sm:$0xff]   ;;  %v5128_v63 = vld [vmem:[%s6107_s2 + $0x1c8] sm:$0xff]  }
  0x16   :  { %4627 = vmatpush3.bf16.msra.mxu0 %v5085_v18  ;;  %v5122_v57 = vld [vmem:[%s6107_s2 + $0x198] sm:$0xff]   ;;  %v5125_v60 = vld [vmem:[%s6107_s2 + $0x110] sm:$0xff]   ;;  %v5129_v0 = vld [vmem:[%s6107_s2 + $0x108] sm:$0xff]  }
  0x17   :  { %4649 = vmatpush3.bf16.msra.mxu1 %v5086_v19  ;;  %4628 = vmatprep.subr.bf16.mxu0 %v5087_v20  ;;  %v5126_v61 = vld [vmem:[%s6107_s2 + $0x190] sm:$0xff]   ;;  %v5130_v1 = vld [vmem:[%s6107_s2 + $0x188] sm:$0xff]   ;;  %v5131_v2 = vld [vmem:[%s6107_s2 + $0x140] sm:$0xff]  }
  0x18   :  { %4650 = vmatprep.subr.bf16.mxu1 %v5088_v21  ;;  %v5132_v3 = vld [vmem:[%s6107_s2 + $0x1c0] sm:$0xff]   ;;  %v60_v6 = vld [vmem:[%s6134_s0 + $0x10] sm:$0xff]  ;;  %v61_v9 = vld [vmem:[%s6134_s0 + $0x18] sm:$0xff] }
  0x19   :  { %v5133_v4 = vld [vmem:[%s6107_s2 + $0x100] sm:$0xff]   ;;  %v4412_v7 = vcombine.low %v60_v6, %v60_v6  ;;  %v4413_v8 = vcombine.high %v60_v6, %v60_v6  ;;  %v4414_v10 = vcombine.low %v61_v9, %v61_v9  ;;  %v4415_v11 = vcombine.high %v61_v9, %v61_v9 }
  0x1a   :  { %4629 = vmatpush3.bf16.msra.mxu0 %v5089_v22  ;;  %v5134_v5 = vld [vmem:[%s6107_s2 + $0x180] sm:$0xff]  }
  0x1b   :  { %4651 = vmatpush3.bf16.msra.mxu1 %v5090_v23  ;;  %4630 = vmatprep.subr.bf16.mxu0 %v5091_v24 }
  0x1c   :  { %4652 = vmatprep.subr.bf16.mxu1 %v5092_v25 }
  0x1e   :  { %4631 = vmatpush3.bf16.msra.mxu0 %v5093_v26 }
  0x1f   :  { %4653 = vmatpush3.bf16.msra.mxu1 %v5094_v27  ;;  %4632 = vmatprep.subr.bf16.mxu0 %v5095_v28 }
  0x20   :  { %4654 = vmatprep.subr.bf16.mxu1 %v5096_v29 }
  0x22   :  { %4633 = vmatpush3.bf16.msra.mxu0 %v5097_v30 }
  0x23   :  { %4655 = vmatpush3.bf16.msra.mxu1 %v5098_v31  ;;  %4662 = vmatprep.subr.bf16.mxu0 %v5103_v38 }
  0x24   :  { %4684 = vmatprep.subr.bf16.mxu1 %v5104_v39 }
  0x25   :  { %635 = vmatmul.mubr.bf16.vlgmr.msra.gmra.mxu0 %v4408_v34 }
  0x26   :  { %675 = vmatmul.mubr.bf16.vlgmr.msra.gmra.mxu1 %v4410_v36  ;;  %4663 = vmatpush3.bf16.msra.mxu0 %v5105_v40 }
  0x27   :  { %4685 = vmatpush3.bf16.msra.mxu1 %v5106_v41  ;;  %4664 = vmatprep.subr.bf16.mxu0 %v5107_v42 }
  0x28   :  { %4686 = vmatprep.subr.bf16.mxu1 %v5108_v43  ;;  %714 = vmatprep.mubr.bf16.mxu0 %v4413_v8 }
  0x29   :  { %754 = vmatprep.mubr.bf16.mxu1 %v4415_v11 }
  0x2a   :  { %4665 = vmatpush3.bf16.msra.mxu0 %v5109_v44 }
  0x2b   :  { %4687 = vmatpush3.bf16.msra.mxu1 %v5110_v45  ;;  %4666 = vmatprep.subr.bf16.mxu0 %v5111_v46 }
  0x2c   :  { %4688 = vmatprep.subr.bf16.mxu1 %v5112_v47 }
  0x2e   :  { %4667 = vmatpush3.bf16.msra.mxu0 %v5113_v48 }
  0x2f   :  { %4689 = vmatpush3.bf16.msra.mxu1 %v5114_v49  ;;  %4668 = vmatprep.subr.bf16.mxu0 %v5115_v50 }
  0x30   :  { %4690 = vmatprep.subr.bf16.mxu1 %v5116_v51 }
  0x32   :  { %4669 = vmatpush3.bf16.msra.mxu0 %v5117_v52 }
  0x33   :  { %4691 = vmatpush3.bf16.msra.mxu1 %v5118_v53  ;;  %4670 = vmatprep.subr.bf16.mxu0 %v5119_v54 }
  0x34   :  { %4692 = vmatprep.subr.bf16.mxu1 %v5120_v55 }
  0x36   :  { %4671 = vmatpush3.bf16.msra.mxu0 %v5121_v56 }
  0x37   :  { %4693 = vmatpush3.bf16.msra.mxu1 %v5122_v57  ;;  %4672 = vmatprep.subr.bf16.mxu0 %v5123_v58 }
  0x38   :  { %4694 = vmatprep.subr.bf16.mxu1 %v5124_v59 }
  0x3a   :  { %4673 = vmatpush3.bf16.msra.mxu0 %v5125_v60 }
  0x3b   :  { %4695 = vmatpush3.bf16.msra.mxu1 %v5126_v61  ;;  %4674 = vmatprep.subr.bf16.mxu0 %v5127_v62 }
  0x3c   :  { %4696 = vmatprep.subr.bf16.mxu1 %v5128_v63 }
  0x3e   :  { %4675 = vmatpush3.bf16.msra.mxu0 %v5129_v0 }
  0x3f   :  { %4697 = vmatpush3.bf16.msra.mxu1 %v5130_v1  ;;  %4676 = vmatprep.subr.bf16.mxu0 %v5131_v2 }
  0x40   :  { %4698 = vmatprep.subr.bf16.mxu1 %v5132_v3 }
  0x42   :  { %4677 = vmatpush3.bf16.msra.mxu0 %v5133_v4 }
  0x43   :  { %4699 = vmatpush3.bf16.msra.mxu1 %v5134_v5 }
  0x45   :  { %715 = vmatmul.mubr.bf16.vlgmr.msra.gmra.mxu0 %v4412_v7 }
  0x46   :  { %755 = vmatmul.mubr.bf16.vlgmr.msra.gmra.mxu1 %v4414_v10 }
  0x47   :  { %22 = vsyncpa [#allocation3], 0  ;;  %s6135_s30 = sld [smem:[#allocation6_spill]]  ;;  %vm778_vm0 = vcmask 1040384   ;;  %vm780_vm1 = vcmask 1044480   ;;  %vm782_vm2 = vcmask 1045504  }
  0x48   :  { %vm786_vm3 = vcmask 261120   ;;  %vm790_vm4 = vcmask 254976   ;;  %v5139_v58 = vld [vmem:[%s6110_s5 + $0x8] sm:$0xff]   ;;  %v5247_v59 = vmov 0.0   ;;  %v5140_v60 = vld [vmem:[%s6110_s5] sm:$0xff]   ;;  %vm5248_vm5 = vmmov 0  }
  0x49   :  { %4798 = vmatprep.subr.bf16.mxu1 %v5247_v59  ;;  %4816 = vmatprep.subr.mxu0 %v5247_v59  ;;  %v4480_v5 = vld [vmem:[%s6108_s3] ss:$0 sm:$0xff]  ;;  %s5249_s25 = smov 88   ;;  %s5250_s26 = smov 96   ;;  %vm1215_vm6 = vcmask 1042432   ;;  %vm904_vm7 = vcmask 64512  }
  0x4a   :  { %4799 = vmatpush3.bf16.msra.mxu1 %v5139_v58  ;;  %4802 = vmatprep.mubr.msk.bf16.mxu1 %vm5248_vm5, %v5247_v59  ;;  %v4481_v9 = vld [vmem:[%s6109_s4] ss:$0 sm:$0xff]  ;;  %s5251_s29 = smov 80   ;;  %s5252_s2 = smov 72   ;;  %vm1564_vm8 = vcmask 39936   ;;  %vm1555_vm9 = vcmask 1041408  }
  0x4b   :  { %4800 = vmatprep.subr.bf16.mxu1 %v5247_v59  ;;  %4818 = vmatprep.mubr.msk.f32.mxu0 %vm5248_vm5, %v5247_v59  ;;  %s5253_s0 = smov 104   ;;  %s5255_s18 = smov 112   ;;  %vm1557_vm10 = vcmask 1046528   ;;  %vm1559_vm11 = vcmask 1043456   ;;  %vm1947_vm12 = vcmask 130048   ;;  %vm1949_vm13 = vcmask 195584  }
  0x4c   :  { %s5256_s19 = smov 56   ;;  %s5257_s1 = smov 48   ;;  %vm2526_vm14 = vcmask 523264  }
  0x4d   :  { %v762_v26 = vld [vmem:[%s6135_s30] sm:$0x1f]  ;;  %s5254_s30 = smov 120   ;;  %s6130_s20 = smov 40  }
  0x4e   :  { %v764_v33 = vrot.slane %v762_v26, 1  ;;  %v767_v34 = vrot.slane %v762_v26, 5  ;;  %v773_v40 = vrot.slane %v762_v26, 3  ;;  %4801 = vmatpush3.bf16.msra.mxu1 %v5140_v60  ;;  %s6124_s21 = smov 64   ;;  %s6129_s22 = smov 8  }
  0x4f   :  { %4806 = vmatprep.subr.mxu1 %v5247_v59  ;;  %s6126_s23 = smov 16  }
  0xe5   :  { %v4634_v12 = vpop.f32.mrf.mxu0 }
  0xe6   :  { %v4656_v13 = vpop.f32.mrf.mxu1 }
  0xe7   :  { %v4635_v14 = vpop.f32.mrf.mxu0 }
  0xe8   :  { %v4657_v15 = vpop.f32.mrf.mxu1  ;;  %v4636_v20 = vadd.f32 %v4635_v14, %v4634_v12 }
  0xe9   :  { %v4637_v16 = vpop.f32.mrf.mxu0  ;;  %v4658_v21 = vadd.f32 %v4657_v15, %v4656_v13 }
  0xea   :  { %v4659_v17 = vpop.f32.mrf.mxu1 }
  0xeb   :  { %v4638_v18 = vpop.f32.mrf.mxu0  ;;  %v677_v27 = vadd.f32 %v4658_v21, %v4636_v20  ;;  %v4485_v17 = vld [vmem:[%s6111_s6] ss:$0 sm:$0xff] }
  0xec   :  { %v4660_v19 = vpop.f32.mrf.mxu1 }
 0x105   :  { %v4678_v22 = vpop.f32.mrf.mxu0 }
 0x106   :  { %v4700_v23 = vpop.f32.mrf.mxu1 }
 0x107   :  { %v4679_v24 = vpop.f32.mrf.mxu0 }
 0x108   :  { %v4701_v25 = vpop.f32.mrf.mxu1  ;;  %v4680_v28 = vadd.f32 %v4679_v24, %v4678_v22 }
 0x109   :  { %v4681_v29 = vpop.f32.mrf.mxu0  ;;  %v4702_v32 = vadd.f32 %v4701_v25, %v4700_v23 }
 0x10a   :  { %v4703_v30 = vpop.f32.mrf.mxu1  ;;  %v717_v31 = vadd.f32 %v4680_v28, %v677_v27 }
 0x10b   :  { %v4682_v35 = vpop.f32.mrf.mxu0 }
 0x10c   :  { %v4704_v36 = vpop.f32.mrf.mxu1  ;;  %v757_v37 = vadd.f32 %v4702_v32, %v717_v31 }
 0x10e   :  { %v766_v38 = vadd.f32 %v764_v33, %v757_v37  ;;  %v769_v39 = vadd.f32 %v767_v34, %v757_v37 }
 0x110   :  { %v771_v41 = vrot.slane %v766_v38, 7  ;;  %v5561_v42 = vrot.slane %v769_v39, 6 }
 0x112   :  { %v779_v43 = vsel %vm778_vm0, %v762_v26, %v771_v41  ;;  %v791_v47 = vsel %vm790_vm4, %v5561_v42, 0.0 }
 0x113   :  { %v781_v44 = vsel %vm780_vm1, %v779_v43, %v773_v40 }
 0x114   :  { %v5567_v45 = vsel %vm782_vm2, %v781_v44, %v5561_v42 }
 0x115   :  { %v787_v46 = vsel %vm786_vm3, %v5567_v45, 0.0 }
 0x116   :  { %788 = vadd.xlane.f32.xlu0 %v787_v46 }
 0x11a   :  { %792 = vadd.xlane.f32.xlu0 %v791_v47 }
 0x19f   :  { %v789_v48 = vpop.xlane.xlu0 %788 }
 0x1a0   :  { %v795_v49 = vmul.f32 0.03125, %v789_v48 }
 0x1a2   :  { %v797_v50 = vsub.f32 %v5567_v45, %v795_v49 }
 0x1a3   :  { %v793_v51 = vpop.xlane.xlu0 %792 }
 0x1a4   :  { %v796_v52 = vmul.f32 0.03125, %v793_v51  ;;  %v799_v53 = vmul.f32 %v797_v50, %v797_v50 }
 0x1a6   :  { %v798_v54 = vsub.f32 %v5561_v42, %v796_v52  ;;  %v801_v55 = vsel %vm786_vm3, %v799_v53, 0.0 }
 0x1a7   :  { %802 = vadd.xlane.f32.xlu1 %v801_v55 }
 0x1a8   :  { %v800_v56 = vmul.f32 %v798_v54, %v798_v54 }
 0x1aa   :  { %v804_v57 = vsel %vm790_vm4, %v800_v56, 0.0 }
 0x1ab   :  { %805 = vadd.xlane.f32.xlu1 %v804_v57 }
 0x230   :  { %v803_v61 = vpop.xlane.xlu1 %802 }
 0x231   :  { %v807_v62 = vmul.f32 0.03125, %v803_v61 }
 0x233   :  { %v809_v63 = vadd.f32 1e-06, %v807_v62 }
 0x234   :  { %v806_v0 = vpop.xlane.xlu1 %805 }
 0x235   :  { %5159 = vrsqrt.f32 %v809_v63  ;;  %v808_v1 = vmul.f32 0.03125, %v806_v0 }
 0x237   :  { %v810_v2 = vadd.f32 1e-06, %v808_v1 }
 0x239   :  { %5161 = vrsqrt.f32 %v810_v2 }
 0x242   :  { %v5160_v3 = vpop.eup %5159 }
 0x243   :  { %v813_v4 = vmul.f32 %v5160_v3, %v797_v50 }
 0x245   :  { %v821_v8 = vmul.f32 %v4480_v5, %v813_v4 }
 0x246   :  { %v5162_v6 = vpop.eup %5161 }
 0x247   :  { %v814_v7 = vmul.f32 %v5162_v6, %v798_v54  ;;  %v829_v11 = vadd.f32 %v4481_v9, %v821_v8 }
 0x249   :  { %v822_v10 = vmul.f32 %v4480_v5, %v814_v7 }
 0x24b   :  { %v830_v12 = vadd.f32 %v4481_v9, %v822_v10 }
 0x24d   :  { %v831_v13 = vpack.c.bf16 %v830_v12, %v829_v11 }
 0x24f   :  { %4803 = vmatmul.mubr.msk.bf16.vlgmr.msra.gmra.mxu1 %vm786_vm3, %v831_v13 }
 0x250   :  { %4808 = vmatprep.mubr.msk.f32.mxu1 %vm5248_vm5, %v5247_v59 }
 0x30f   :  { %v5600_v14 = vpop.f32.mrf.mxu1 }
 0x310   :  { %982 = vrot.lane.b32.xlu1 %v5600_v14, %s5249_s25  ;;  %902 = vrot.lane.b32.xlu0 %v5600_v14, %s5250_s26  ;;  %v899_v19 = vadd.f32 %v4485_v17, %v5600_v14  ;;  %v1220_v22 = vrot.slane %v5600_v14, 5 }
 0x311   :  { %v4804_v15 = vpop.f32.mrf.mxu1 }
 0x312   :  { %v1216_v25 = vrot.slane %v899_v19, 5 }
 0x313   :  { %v888_v16 = vpop.f32.mrf.mxu1 }
 0x314   :  { %1060 = vrot.lane.b32.xlu1 %v5600_v14, %s5251_s29  ;;  %1138 = vrot.lane.b32.xlu0 %v5600_v14, %s5252_s2  ;;  %v900_v20 = vadd.f32 %v4485_v17, %v888_v16  ;;  %v1221_v21 = vrot.slane %v888_v16, 5 }
 0x315   :  { %v4805_v18 = vpop.f32.mrf.mxu1 }
 0x316   :  { %v1217_v23 = vrot.slane %v900_v20, 5  ;;  %v5618_v24 = vsel %vm1215_vm6, %v1220_v22, %v1221_v21 }
 0x318   :  { %1136 = vrot.lane.b32.xlu0 %v899_v19, %s5253_s0  ;;  %980 = vrot.lane.b32.xlu1 %v899_v19, %s5254_s30  ;;  %v1218_v26 = vsel %vm1215_vm6, %v1216_v25, %v1217_v23 }
 0x31c   :  { %1058 = vrot.lane.b32.xlu1 %v899_v19, %s5255_s18  ;;  %1301 = vrot.lane.b32.xlu0 %v5618_v24, %s5249_s25 }
 0x320   :  { %1223 = vrot.lane.b32.xlu1 %v5618_v24, %s5250_s26  ;;  %1299 = vrot.lane.b32.xlu0 %v1218_v26, %s5254_s30 }
 0x324   :  { %1379 = vrot.lane.b32.xlu1 %v5618_v24, %s5251_s29  ;;  %1457 = vrot.lane.b32.xlu0 %v5618_v24, %s5252_s2 }
 0x328   :  { %1377 = vrot.lane.b32.xlu1 %v1218_v26, %s5255_s18 }
 0x32c   :  { %1455 = vrot.lane.b32.xlu1 %v1218_v26, %s5253_s0 }
 0x382   :  { %v983_v27 = vpop.permute.xlu1 %982  ;;  %v903_v28 = vpop.permute.xlu0 %902 }
 0x383   :  { %4807 = vmatpush3.xpose.msk.msra.mxu1 %vm904_vm7, %v903_v28 }
 0x384   :  { %4811 = vmatprep.subr.mxu1 %v5247_v59 }
 0x386   :  { %v1061_v29 = vpop.permute.xlu1 %1060  ;;  %v1139_v30 = vpop.permute.xlu0 %1138  ;;  %4809 = vmatmul.mubr.msk.f32.vlgmr.msra.gmra.mxu1 %vm904_vm7, %v899_v19 }
 0x387   :  { %4812 = vmatpush3.xpose.msk.msra.mxu1 %vm904_vm7, %v983_v27  ;;  %4817 = vmatpush3.xpose.msk.msra.mxu0 %vm904_vm7, %v1061_v29 }
 0x388   :  { %4813 = vmatprep.mubr.msk.f32.mxu1 %vm5248_vm5, %v5247_v59  ;;  %4821 = vmatprep.subr.mxu1 %v5247_v59 }
 0x389   :  { %4826 = vmatprep.subr.mxu0 %v5247_v59 }
 0x38a   :  { %v1137_v31 = vpop.permute.xlu0 %1136  ;;  %v981_v32 = vpop.permute.xlu1 %980 }
 0x38b   :  { %4814 = vmatmul.mubr.msk.f32.vlgmr.msra.gmra.mxu1 %vm904_vm7, %v981_v32 }
 0x38c   :  { %4822 = vmatpush3.xpose.msk.msra.mxu1 %vm904_vm7, %v1139_v30  ;;  %4823 = vmatprep.mubr.msk.f32.mxu1 %vm5248_vm5, %v5247_v59 }
 0x38d   :  { %4831 = vmatprep.subr.mxu1 %v5247_v59 }
 0x38e   :  { %v1059_v33 = vpop.permute.xlu1 %1058  ;;  %v1302_v34 = vpop.permute.xlu0 %1301 }
 0x38f   :  { %4819 = vmatmul.mubr.msk.f32.vlgmr.msra.gmra.mxu0 %vm904_vm7, %v1059_v33  ;;  %4824 = vmatmul.mubr.msk.f32.vlgmr.msra.gmra.mxu1 %vm904_vm7, %v1137_v31 }
 0x390   :  { %4832 = vmatpush3.xpose.msk.msra.mxu1 %vm904_vm7, %v1302_v34  ;;  %4833 = vmatprep.mubr.msk.f32.mxu1 %vm5248_vm5, %v5247_v59 }
 0x391   :  { %4828 = vmatprep.mubr.msk.f32.mxu0 %vm5248_vm5, %v5247_v59  ;;  %4841 = vmatprep.subr.mxu1 %v5247_v59 }
 0x392   :  { %v1224_v35 = vpop.permute.xlu1 %1223  ;;  %v1300_v36 = vpop.permute.xlu0 %1299 }
 0x393   :  { %4827 = vmatpush3.xpose.msk.msra.mxu0 %vm904_vm7, %v1224_v35  ;;  %4834 = vmatmul.mubr.msk.f32.vlgmr.msra.gmra.mxu1 %vm904_vm7, %v1300_v36 }
 0x394   :  { %4836 = vmatprep.subr.mxu0 %v5247_v59  ;;  %4843 = vmatprep.mubr.msk.f32.mxu1 %vm5248_vm5, %v5247_v59 }
 0x396   :  { %v1380_v37 = vpop.permute.xlu1 %1379  ;;  %v1458_v38 = vpop.permute.xlu0 %1457  ;;  %4829 = vmatmul.mubr.msk.f32.vlgmr.msra.gmra.mxu0 %vm904_vm7, %v1218_v26 }
 0x397   :  { %4837 = vmatpush3.xpose.msk.msra.mxu0 %vm904_vm7, %v1380_v37  ;;  %4842 = vmatpush3.xpose.msk.msra.mxu1 %vm904_vm7, %v1458_v38 }
 0x398   :  { %4838 = vmatprep.mubr.msk.f32.mxu0 %vm5248_vm5, %v5247_v59  ;;  %4851 = vmatprep.subr.mxu1 %v5247_v59 }
 0x399   :  { %4846 = vmatprep.subr.mxu0 %v5247_v59 }
 0x39a   :  { %v1378_v39 = vpop.permute.xlu1 %1377 }
 0x39b   :  { %4839 = vmatmul.mubr.msk.f32.vlgmr.msra.gmra.mxu0 %vm904_vm7, %v1378_v39 }
 0x39c   :  { %4848 = vmatprep.mubr.msk.f32.mxu0 %vm5248_vm5, %v5247_v59 }
 0x39e   :  { %v1456_v40 = vpop.permute.xlu1 %1455 }
 0x39f   :  { %4844 = vmatmul.mubr.msk.f32.vlgmr.msra.gmra.mxu1 %vm904_vm7, %v1456_v40 }
 0x3a0   :  { %4853 = vmatprep.mubr.msk.f32.mxu1 %vm5248_vm5, %v5247_v59 }
 0x446   :  { %v976_v41 = vpop.f32.mrf.mxu1 }
 0x448   :  { %v4810_v43 = vpop.f32.mrf.mxu1 }
 0x44b   :  { %v1054_v44 = vpop.f32.mrf.mxu1 }
 0x44c   :  { %v1534_v46 = vrot.slane %v1054_v44, 3 }
 0x44d   :  { %v4815_v47 = vpop.f32.mrf.mxu1 }
 0x44e   :  { %v1554_v48 = vsel %vm780_vm1, %v976_v41, %v1534_v46 }
 0x44f   :  { %v1132_v49 = vpop.f32.mrf.mxu0  ;;  %v1210_v50 = vpop.f32.mrf.mxu1  ;;  %v1565_v51 = vsel %vm1564_vm8, %v1554_v48, -inf }
 0x450   :  { %v1537_v52 = vrot.slane %v1132_v49, 6  ;;  %v1540_v53 = vrot.slane %v1210_v50, 1  ;;  %1566 = vmax.xlane.f32.xlu0 %v1565_v51 }
 0x451   :  { %v4820_v54 = vpop.f32.mrf.mxu0  ;;  %v4825_v55 = vpop.f32.mrf.mxu1 }
 0x452   :  { %v1556_v56 = vsel %vm1555_vm9, %v1534_v46, %v1537_v52 }
 0x453   :  { %v1373_v57 = vpop.f32.mrf.mxu1  ;;  %v1558_v58 = vsel %vm1557_vm10, %v1556_v56, %v1540_v53 }
 0x454   :  { %v1568_v60 = vsel %vm1564_vm8, %v1558_v58, -inf  ;;  %v1546_v3 = vrot.slane %v1373_v57, 7 }
 0x455   :  { %1569 = vmax.xlane.f32.xlu1 %v1568_v60  ;;  %v4835_v61 = vpop.f32.mrf.mxu1 }
 0x456   :  { %v1295_v62 = vpop.f32.mrf.mxu0 }
 0x457   :  { %v1543_v63 = vrot.slane %v1295_v62, 4 }
 0x458   :  { %v4830_v0 = vpop.f32.mrf.mxu0 }
 0x459   :  { %v1560_v1 = vsel %vm1559_vm11, %v1540_v53, %v1543_v63  ;;  %v1561_v7 = vsel %vm778_vm0, %v1543_v63, %v1546_v3 }
 0x45a   :  { %v1571_v2 = vsel %vm1564_vm8, %v1560_v1, -inf }
 0x45b   :  { %v1451_v4 = vpop.f32.mrf.mxu0  ;;  %1572 = vmax.xlane.f32.xlu0 %v1571_v2 }
 0x45c   :  { %v1549_v5 = vrot.slane %v1451_v4, 2 }
 0x45d   :  { %v4840_v6 = vpop.f32.mrf.mxu0 }
 0x45e   :  { %v1562_v8 = vsel %vm782_vm2, %v1561_v7, %v1549_v5 }
 0x45f   :  { %v1529_v9 = vpop.f32.mrf.mxu1  ;;  %v1574_v10 = vsel %vm1564_vm8, %v1562_v8, -inf }
 0x460   :  { %v1552_v11 = vrot.slane %v1529_v9, 5  ;;  %1575 = vmax.xlane.f32.xlu0 %v1574_v10 }
 0x461   :  { %v4845_v12 = vpop.f32.mrf.mxu1 }
 0x462   :  { %v1563_v13 = vsel %vm1215_vm6, %v1549_v5, %v1552_v11 }
 0x463   :  { %v1577_v15 = vsel %vm1564_vm8, %v1563_v13, -inf }
 0x464   :  { %1578 = vmax.xlane.f32.xlu0 %v1577_v15 }
 0x4d9   :  { %v1567_v16 = vpop.xlane.xlu0 %1566 }
 0x4da   :  { %v1580_v17 = vsub.f32 %v1554_v48, %v1567_v16 }
 0x4dc   :  { %v1585_v18 = vmul.f32 1.442695, %v1580_v17 }
 0x4de   :  { %5163 = vpow2.f32 %v1585_v18  ;;  %v1570_v19 = vpop.xlane.xlu1 %1569 }
 0x4df   :  { %v1581_v20 = vsub.f32 %v1558_v58, %v1570_v19 }
 0x4e1   :  { %v1587_v21 = vmul.f32 1.442695, %v1581_v20 }
 0x4e3   :  { %5165 = vpow2.f32 %v1587_v21 }
 0x4e4   :  { %v1573_v27 = vpop.xlane.xlu0 %1572 }
 0x4e5   :  { %v1582_v30 = vsub.f32 %v1560_v1, %v1573_v27 }
 0x4e7   :  { %v1589_v32 = vmul.f32 1.442695, %v1582_v30 }
 0x4e9   :  { %v1576_v28 = vpop.xlane.xlu0 %1575 }
 0x4ea   :  { %v1583_v29 = vsub.f32 %v1562_v8, %v1576_v28 }
 0x4eb   :  { %v5164_v22 = vpop.eup %5163 }
 0x4ec   :  { %v1595_v23 = vsel %vm1564_vm8, %v5164_v22, 0.0  ;;  %v1591_v31 = vmul.f32 1.442695, %v1583_v29 }
 0x4ed   :  { %1596 = vadd.xlane.f32.xlu1 %v1595_v23 }
 0x4ee   :  { %5167 = vpow2.f32 %v1591_v31 }
 0x4ef   :  { %5169 = vpow2.f32 %v1589_v32  ;;  %v5141_v32 = vld [vmem:[%s6112_s7 + $0x8] sm:$0xff]  }
 0x4f0   :  { %v5166_v25 = vpop.eup %5165 }
 0x4f1   :  { %v1598_v26 = vsel %vm1564_vm8, %v5166_v25, 0.0 }
 0x4f2   :  { %1599 = vadd.xlane.f32.xlu0 %v1598_v26 }
 0x4fb   :  { %v5168_v33 = vpop.eup %5167 }
 0x4fc   :  { %v5170_v34 = vpop.eup %5169  ;;  %v1604_v35 = vsel %vm1564_vm8, %v5168_v33, 0.0 }
 0x4fd   :  { %v1601_v36 = vsel %vm1564_vm8, %v5170_v34, 0.0 }
 0x4fe   :  { %1701 = vrot.lane.b32.xlu1 %v5600_v14, %s5256_s19 }
 0x502   :  { %1778 = vrot.lane.b32.xlu1 %v5600_v14, %s5257_s1 }
 0x506   :  { %1858 = vrot.lane.b32.xlu1 %v5600_v14, %s6130_s20 }
 0x508   :  { %1620 = vrot.lane.b32.xlu0 %v5600_v14, %s6124_s21  ;;  %v1579_v14 = vpop.xlane.xlu0 %1578 }
 0x509   :  { %v1584_v37 = vsub.f32 %v1563_v13, %v1579_v14 }
 0x50b   :  { %v1593_v38 = vmul.f32 1.442695, %v1584_v37 }
 0x50d   :  { %5171 = vpow2.f32 %v1593_v38 }
 0x51a   :  { %v5703_v39 = vpop.eup %5171 }
 0x51b   :  { %v1607_v40 = vsel %vm1564_vm8, %v5703_v39, 0.0 }
 0x527   :  { %1605 = vadd.xlane.f32.xlu0 %v1604_v35 }
 0x52a   :  { %1602 = vadd.xlane.f32.xlu1 %v1601_v36 }
 0x53b   :  { %2032 = vrot.lane.b32.xlu1 %v5618_v24, %s5256_s19 }
 0x53d   :  { %1955 = vrot.lane.b32.xlu0 %v5618_v24, %s6124_s21  ;;  %s6127_s21 = smov 24  }
 0x541   :  { %2112 = vrot.lane.b32.xlu0 %v5618_v24, %s5257_s1 }
 0x55f   :  { %1608 = vadd.xlane.f32.xlu1 %v1607_v40 }
 0x570   :  { %2189 = vrot.lane.b32.xlu1 %v5618_v24, %s6130_s20 }
 0x576   :  { %v1597_v41 = vpop.xlane.xlu1 %1596 }
 0x577   :  { %5173 = vrcp.f32 %v1597_v41 }
 0x57a   :  { %v1702_v43 = vpop.permute.xlu1 %1701 }
 0x57b   :  { %4852 = vmatpush3.msk.msra.mxu1 %vm780_vm1, %v1702_v43  ;;  %v1600_v44 = vpop.xlane.xlu0 %1599 }
 0x57c   :  { %5175 = vrcp.f32 %v1600_v44  ;;  %4861 = vmatprep.subr.mxu1 %v5247_v59 }
 0x57e   :  { %v1779_v49 = vpop.permute.xlu1 %1778 }
 0x57f   :  { %v1621_v46 = vpop.permute.xlu0 %1620 }
 0x580   :  { %4847 = vmatpush3.msk.msra.mxu0 %vm780_vm1, %v1621_v46 }
 0x581   :  { %4856 = vmatprep.subr.mxu0 %v5247_v59 }
 0x582   :  { %v1859_v55 = vpop.permute.xlu1 %1858 }
 0x584   :  { %v5174_v47 = vpop.eup %5173 }
 0x585   :  { %v1615_v48 = vmul.f32 %v5174_v47, %v5164_v22 }
 0x587   :  { %4849 = vmatmul.mubr.msk.f32.vlgmr.msra.gmra.mxu0 %vm1564_vm8, %v1615_v48  ;;  %v1698_v52 = vrot.slane %v1615_v48, 5 }
 0x588   :  { %4857 = vmatpush3.msk.msra.mxu0 %vm780_vm1, %v1779_v49  ;;  %4858 = vmatprep.mubr.msk.f32.mxu0 %vm5248_vm5, %v5247_v59 }
 0x589   :  { %v5176_v24 = vpop.eup %5175  ;;  %4866 = vmatprep.subr.mxu0 %v5247_v59 }
 0x58a   :  { %v1616_v50 = vmul.f32 %v5176_v24, %v5166_v25 }
 0x58c   :  { %v1777_v51 = vrot.slane %v1616_v50, 2  ;;  %v1699_v53 = vrot.slane %v1616_v50, 5  ;;  %v1855_v0 = vrot.slane %v1616_v50, 7 }
 0x58e   :  { %4859 = vmatmul.mubr.msk.f32.vlgmr.msra.gmra.mxu0 %vm1564_vm8, %v1777_v51  ;;  %v1700_v54 = vsel %vm1215_vm6, %v1698_v52, %v1699_v53 }
 0x58f   :  { %4854 = vmatmul.mubr.msk.f32.vlgmr.msra.gmra.mxu1 %vm1564_vm8, %v1700_v54  ;;  %4868 = vmatprep.mubr.msk.f32.mxu0 %vm5248_vm5, %v5247_v59 }
 0x590   :  { %4862 = vmatpush3.msk.msra.mxu1 %vm780_vm1, %v1859_v55  ;;  %4863 = vmatprep.mubr.msk.f32.mxu1 %vm5248_vm5, %v5247_v59 }
 0x591   :  { %4871 = vmatprep.subr.mxu1 %v5247_v59 }
 0x5b0   :  { %v1606_v56 = vpop.xlane.xlu0 %1605 }
 0x5b1   :  { %5177 = vrcp.f32 %v1606_v56 }
 0x5b3   :  { %v1603_v57 = vpop.xlane.xlu1 %1602 }
 0x5b4   :  { %5179 = vrcp.f32 %v1603_v57  ;;  %v1956_v58 = vpop.permute.xlu0 %1955  ;;  %v4521_v57 = vld [vmem:[%s6113_s8] ss:$0 sm:$0xff] }
 0x5b5   :  { %4867 = vmatpush3.msk.msra.mxu0 %vm780_vm1, %v1956_v58 }
 0x5b6   :  { %4876 = vmatprep.subr.mxu0 %v5247_v59 }
 0x5b7   :  { %v2033_v6 = vpop.permute.xlu1 %2032 }
 0x5b8   :  { %v2113_v7 = vpop.permute.xlu0 %2112 }
 0x5be   :  { %v5178_v60 = vpop.eup %5177 }
 0x5bf   :  { %v1618_v61 = vmul.f32 %v5178_v60, %v5168_v33  ;;  %v5142_v33 = vld [vmem:[%s6112_s7] sm:$0xff]  }
 0x5c1   :  { %v5180_v62 = vpop.eup %5179  ;;  %v1953_v3 = vrot.slane %v1618_v61, 4  ;;  %v2031_v8 = vrot.slane %v1618_v61, 1  ;;  %v2109_v15 = vrot.slane %v1618_v61, 6 }
 0x5c2   :  { %v1617_v63 = vmul.f32 %v5180_v62, %v5170_v34 }
 0x5c4   :  { %v1856_v1 = vrot.slane %v1617_v63, 7  ;;  %v1952_v2 = vrot.slane %v1617_v63, 4 }
 0x5c6   :  { %v1857_v4 = vsel %vm778_vm0, %v1855_v0, %v1856_v1  ;;  %v1954_v5 = vsel %vm1559_vm11, %v1952_v2, %v1953_v3 }
 0x5c7   :  { %4864 = vmatmul.mubr.msk.f32.vlgmr.msra.gmra.mxu1 %vm1564_vm8, %v1857_v4  ;;  %4869 = vmatmul.mubr.msk.f32.vlgmr.msra.gmra.mxu0 %vm1564_vm8, %v1954_v5 }
 0x5c8   :  { %4872 = vmatpush3.msk.msra.mxu1 %vm780_vm1, %v2033_v6  ;;  %4877 = vmatpush3.msk.msra.mxu0 %vm780_vm1, %v2113_v7 }
 0x5c9   :  { %4873 = vmatprep.mubr.msk.f32.mxu1 %vm5248_vm5, %v5247_v59  ;;  %4881 = vmatprep.subr.mxu1 %v5247_v59 }
 0x5ca   :  { %4878 = vmatprep.mubr.msk.f32.mxu0 %vm5248_vm5, %v5247_v59  ;;  %4886 = vmatprep.subr.bf16.mxu0 %v5247_v59 }
 0x5cb   :  { %4874 = vmatmul.mubr.msk.f32.vlgmr.msra.gmra.mxu1 %vm1564_vm8, %v2031_v8 }
 0x5cc   :  { %4883 = vmatprep.mubr.msk.f32.mxu1 %vm5248_vm5, %v5247_v59 }
 0x5e8   :  { %v1609_v9 = vpop.xlane.xlu1 %1608 }
 0x5e9   :  { %5181 = vrcp.f32 %v1609_v9 }
 0x5ec   :  { %v2190_v10 = vpop.permute.xlu1 %2189 }
 0x5ed   :  { %4882 = vmatpush3.msk.msra.mxu1 %vm780_vm1, %v2190_v10 }
 0x5ee   :  { %4894 = vmatprep.subr.bf16.mxu1 %v5247_v59 }
 0x5f6   :  { %v5182_v11 = vpop.eup %5181 }
 0x5f7   :  { %v1619_v12 = vmul.f32 %v5182_v11, %v5703_v39 }
 0x5f9   :  { %v2188_v13 = vrot.slane %v1619_v12, 3  ;;  %v2110_v16 = vrot.slane %v1619_v12, 6  ;;  %v5143_v12 = vld [vmem:[%s6116_s11 + $0x8] sm:$0xff]  }
 0x5fb   :  { %4884 = vmatmul.mubr.msk.f32.vlgmr.msra.gmra.mxu1 %vm1564_vm8, %v2188_v13  ;;  %v2111_v17 = vsel %vm1555_vm9, %v2109_v15, %v2110_v16  ;;  %v5144_v13 = vld [vmem:[%s6116_s11] sm:$0xff]  }
 0x5fc   :  { %4879 = vmatmul.mubr.msk.f32.vlgmr.msra.gmra.mxu0 %vm1564_vm8, %v2111_v17  ;;  %4898 = vmatprep.mubr.msk.bf16.mxu1 %vm5248_vm5, %v5247_v59 }
 0x5fd   :  { %4890 = vmatprep.mubr.msk.bf16.mxu0 %vm5248_vm5, %v5247_v59  ;;  %4887 = vmatpush3.bf16.msra.mxu0 %v5141_v32 }
 0x5fe   :  { %4888 = vmatprep.subr.bf16.mxu0 %v5247_v59  ;;  %4895 = vmatpush3.bf16.msra.mxu1 %v5143_v12 }
 0x5ff   :  { %4896 = vmatprep.subr.bf16.mxu1 %v5247_v59 }
 0x601   :  { %4889 = vmatpush3.bf16.msra.mxu0 %v5142_v33  ;;  %v5145_v33 = vld [vmem:[%s6118_s13 + $0x18] sm:$0xff]  }
 0x602   :  { %4902 = vmatprep.subr.bf16.mxu0 %v5247_v59  ;;  %4897 = vmatpush3.bf16.msra.mxu1 %v5144_v13 }
 0x603   :  { %4914 = vmatprep.subr.bf16.mxu1 %v5247_v59 }
 0x647   :  { %v1693_v18 = vpop.f32.mrf.mxu0 }
 0x649   :  { %v4850_v19 = vpop.f32.mrf.mxu0 }
 0x64e   :  { %v1850_v20 = vpop.f32.mrf.mxu0 }
 0x64f   :  { %v1773_v21 = vpop.f32.mrf.mxu1 }
 0x650   :  { %v4860_v22 = vpop.f32.mrf.mxu0 }
 0x651   :  { %v4855_v23 = vpop.f32.mrf.mxu1 }
 0x652   :  { %v4522_v23 = vld [vmem:[%s6114_s9] ss:$0 sm:$0xff] }
 0x687   :  { %v1930_v25 = vpop.f32.mrf.mxu1  ;;  %v2027_v26 = vpop.f32.mrf.mxu0 }
 0x689   :  { %v4865_v27 = vpop.f32.mrf.mxu1  ;;  %v4870_v28 = vpop.f32.mrf.mxu0 }
 0x68a   :  { %v4523_v28 = vld [vmem:[%s6115_s10] ss:$0 sm:$0xff] }
 0x68b   :  { %v2104_v29 = vpop.f32.mrf.mxu1 }
 0x68c   :  { %v5047_v30 = vpack.i.bf16 %v1773_v21, %v2104_v29 }
 0x68d   :  { %v4875_v31 = vpop.f32.mrf.mxu1 }
 0x68e   :  { %5048 = vrot.lane.b32.xlu0 %v5047_v30, %s6129_s22 }
 0x6bb   :  { %v2261_v34 = vpop.f32.mrf.mxu1 }
 0x6bc   :  { %v2184_v35 = vpop.f32.mrf.mxu0  ;;  %2274 = vrot.lane.b32.xlu0 %v2261_v34, %s6127_s21  ;;  %v5146_v34 = vld [vmem:[%s6118_s13 + $0x10] sm:$0xff]  }
 0x6bd   :  { %v5052_v36 = vpack.i.bf16 %v1850_v20, %v2184_v35  ;;  %v4885_v14 = vpop.f32.mrf.mxu1  ;;  %v5147_v35 = vld [vmem:[%s6118_s13 + $0x8] sm:$0xff]  }
 0x6be   :  { %v4880_v37 = vpop.f32.mrf.mxu0  ;;  %v4524_v14 = vld [vmem:[%s6117_s12] ss:$0 sm:$0xff] }
 0x6bf   :  { %5053 = vrot.lane.b32.xlu1 %v5052_v36, %s6126_s23  ;;  %v5148_v36 = vld [vmem:[%s6118_s13] sm:$0xff]  }
 0x6c3   :  { %1943 = vrot.lane.b32.xlu1 %v1930_v25, %s6127_s21 }
 0x700   :  { %v5049_v38 = vpop.permute.xlu0 %5048 }
 0x701   :  { %v5051_v39 = vunpack.i.h.bf16 %v5049_v38  ;;  %v5050_v40 = vunpack.i.l.bf16 %v5049_v38 }
 0x703   :  { %v2277_v46 = vsel %vm904_vm7, %v2027_v26, %v5050_v40  ;;  %v1946_v47 = vsel %vm904_vm7, %v1693_v18, %v5051_v39 }
 0x72e   :  { %v2275_v48 = vpop.permute.xlu0 %2274 }
 0x731   :  { %v5054_v41 = vpop.permute.xlu1 %5053 }
 0x732   :  { %v5056_v43 = vunpack.i.h.bf16 %v5054_v41  ;;  %v5055_v44 = vunpack.i.l.bf16 %v5054_v41 }
 0x734   :  { %v2278_v49 = vsel %vm1947_vm12, %v2277_v46, %v5055_v44  ;;  %v1948_v24 = vsel %vm1947_vm12, %v1946_v47, %v5056_v43 }
 0x735   :  { %v1944_v50 = vpop.permute.xlu1 %1943  ;;  %v2279_v51 = vsel %vm1949_vm13, %v2278_v49, %v2275_v48 }
 0x736   :  { %v1950_v52 = vsel %vm1949_vm13, %v1948_v24, %v1944_v50  ;;  %v2281_v53 = vrot.slane %v2279_v51, 3 }
 0x738   :  { %v2283_v54 = vsel %vm780_vm1, %v1950_v52, %v2281_v53 }
 0x739   :  { %v2284_v55 = vpack.c.bf16 %v2281_v53, %v2283_v54 }
 0x73b   :  { %4891 = vmatmul.mubr.msk.bf16.vlgmr.msra.gmra.mxu0 %vm786_vm3, %v2284_v55 }
 0x73c   :  { %4910 = vmatprep.mubr.msk.bf16.mxu0 %vm5248_vm5, %v5247_v59  ;;  %4903 = vmatpush3.bf16.msra.mxu0 %v5145_v33 }
 0x73d   :  { %4904 = vmatprep.subr.bf16.mxu0 %v5247_v59 }
 0x740   :  { %4905 = vmatpush3.bf16.msra.mxu0 %v5146_v34 }
 0x741   :  { %4906 = vmatprep.subr.bf16.mxu0 %v5247_v59 }
 0x744   :  { %4907 = vmatpush3.bf16.msra.mxu0 %v5147_v35  ;;  %v4537_v35 = vld [vmem:[%s6109_s4 + $0x1] ss:$0 sm:$0xff] }
 0x745   :  { %4908 = vmatprep.subr.bf16.mxu0 %v5247_v59 }
 0x748   :  { %4909 = vmatpush3.bf16.msra.mxu0 %v5148_v36 }
 0x749   :  { %4932 = vmatprep.subr.mxu0 %v5247_v59 }
 0x7fb   :  { %v2338_v56 = vpop.f32.mrf.mxu0 }
 0x7fc   :  { %v2345_v58 = vadd.f32 %v2338_v56, %v5567_v45 }
 0x7fd   :  { %v4892_v60 = vpop.f32.mrf.mxu0 }
 0x7fe   :  { %v5780_v61 = vadd.f32 %v4521_v57, %v2345_v58 }
 0x7ff   :  { %v2341_v62 = vpop.f32.mrf.mxu0 }
 0x800   :  { %v2346_v63 = vadd.f32 %v2341_v62, %v5561_v42  ;;  %v2358_v0 = vsel %vm786_vm3, %v5780_v61, 0.0 }
 0x801   :  { %2359 = vadd.xlane.f32.xlu0 %v2358_v0  ;;  %v4893_v1 = vpop.f32.mrf.mxu0 }
 0x802   :  { %v5785_v2 = vadd.f32 %v4521_v57, %v2346_v63  ;;  %v4528_v1 = vld [vmem:[%s6119_s14] ss:$0 sm:$0xff] }
 0x804   :  { %v2361_v3 = vsel %vm790_vm4, %v5785_v2, 0.0 }
 0x805   :  { %2362 = vadd.xlane.f32.xlu1 %v2361_v3 }
 0x88a   :  { %v2360_v4 = vpop.xlane.xlu0 %2359 }
 0x88b   :  { %v2364_v5 = vmul.f32 0.03125, %v2360_v4 }
 0x88d   :  { %v2366_v45 = vsub.f32 %v5780_v61, %v2364_v5 }
 0x88e   :  { %v2363_v6 = vpop.xlane.xlu1 %2362 }
 0x88f   :  { %v2365_v7 = vmul.f32 0.03125, %v2363_v6  ;;  %v2368_v8 = vmul.f32 %v2366_v45, %v2366_v45 }
 0x891   :  { %v2367_v42 = vsub.f32 %v5785_v2, %v2365_v7  ;;  %v2370_v9 = vsel %vm786_vm3, %v2368_v8, 0.0 }
 0x892   :  { %2371 = vadd.xlane.f32.xlu0 %v2370_v9 }
 0x893   :  { %v2369_v10 = vmul.f32 %v2367_v42, %v2367_v42 }
 0x895   :  { %v2373_v11 = vsel %vm790_vm4, %v2369_v10, 0.0 }
 0x896   :  { %2374 = vadd.xlane.f32.xlu0 %v2373_v11 }
 0x91b   :  { %v2372_v15 = vpop.xlane.xlu0 %2371 }
 0x91c   :  { %v2376_v16 = vmul.f32 0.03125, %v2372_v15 }
 0x91e   :  { %v2378_v17 = vadd.f32 1e-06, %v2376_v16 }
 0x91f   :  { %v2375_v18 = vpop.xlane.xlu0 %2374 }
 0x920   :  { %5183 = vrsqrt.f32 %v2378_v17  ;;  %v2377_v19 = vmul.f32 0.03125, %v2375_v18 }
 0x922   :  { %v2379_v20 = vadd.f32 1e-06, %v2377_v19 }
 0x924   :  { %5185 = vrsqrt.f32 %v2379_v20  ;;  %v5149_v20 = vld [vmem:[%s6110_s5 + $0x18] sm:$0xff]  }
 0x92d   :  { %v5184_v21 = vpop.eup %5183 }
 0x92e   :  { %v2382_v22 = vmul.f32 %v5184_v21, %v2366_v45  ;;  %v5150_v21 = vld [vmem:[%s6110_s5 + $0x10] sm:$0xff]  }
 0x930   :  { %v2390_v27 = vmul.f32 %v4522_v23, %v2382_v22 }
 0x931   :  { %v5186_v25 = vpop.eup %5185 }
 0x932   :  { %v2383_v26 = vmul.f32 %v5186_v25, %v2367_v42  ;;  %v2398_v30 = vadd.f32 %v4523_v28, %v2390_v27 }
 0x934   :  { %v2391_v29 = vmul.f32 %v4522_v23, %v2383_v26 }
 0x936   :  { %v2399_v31 = vadd.f32 %v4523_v28, %v2391_v29 }
 0x938   :  { %v2400_v32 = vpack.c.bf16 %v2399_v31, %v2398_v30  ;;  %v4536_v31 = vld [vmem:[%s6108_s3 + $0x1] ss:$0 sm:$0xff] }
 0x93a   :  { %4899 = vmatmul.mubr.msk.bf16.vlgmr.msra.gmra.mxu1 %vm786_vm3, %v2400_v32 }
 0x93b   :  { %4918 = vmatprep.mubr.msk.bf16.mxu1 %vm5248_vm5, %v5247_v59  ;;  %4915 = vmatpush3.bf16.msra.mxu1 %v5149_v20 }
 0x93c   :  { %4916 = vmatprep.subr.bf16.mxu1 %v5247_v59 }
 0x93f   :  { %4917 = vmatpush3.bf16.msra.mxu1 %v5150_v21 }
 0x940   :  { %4922 = vmatprep.subr.mxu1 %v5247_v59 }
 0x9fa   :  { %v2461_v37 = vpop.f32.mrf.mxu1 }
 0x9fb   :  { %v2462_v38 = vadd.f32 %v4524_v14, %v2461_v37 }
 0x9fc   :  { %v4900_v39 = vpop.f32.mrf.mxu1 }
 0x9fd   :  { %v2468_v40 = vmul.f32 %v2462_v38, %v2462_v38 }
 0x9fe   :  { %v2464_v41 = vpop.f32.mrf.mxu1 }
 0x9ff   :  { %v2470_v43 = vmul.f32 %v2468_v40, %v2462_v38  ;;  %v2465_v44 = vadd.f32 %v4524_v14, %v2464_v41 }
 0xa00   :  { %v4901_v46 = vpop.f32.mrf.mxu1 }
 0xa01   :  { %v2472_v47 = vmul.f32 0.044715, %v2470_v43  ;;  %v2469_v48 = vmul.f32 %v2465_v44, %v2465_v44  ;;  %v4546_v43 = vld [vmem:[%s6111_s6 + $0x1] ss:$0 sm:$0xff]  ;;  %s6136_s6 = smov 40  }
 0xa03   :  { %v2474_v49 = vadd.f32 %v2472_v47, %v2462_v38  ;;  %v2471_v24 = vmul.f32 %v2469_v48, %v2465_v44 }
 0xa05   :  { %v2476_v50 = vmul.f32 0.7978846, %v2474_v49  ;;  %v2473_v51 = vmul.f32 0.044715, %v2471_v24 }
 0xa07   :  { %5187 = vtanh.f32 %v2476_v50  ;;  %v2475_v52 = vadd.f32 %v2473_v51, %v2465_v44 }
 0xa09   :  { %v2477_v53 = vmul.f32 0.7978846, %v2475_v52 }
 0xa0b   :  { %5189 = vtanh.f32 %v2477_v53 }
 0xa14   :  { %v5188_v54 = vpop.eup %5187 }
 0xa15   :  { %v2480_v55 = vadd.f32 1.0, %v5188_v54 }
 0xa17   :  { %v2482_v57 = vmul.f32 0.5, %v2480_v55 }
 0xa18   :  { %v5190_v56 = vpop.eup %5189 }
 0xa19   :  { %v2481_v58 = vadd.f32 1.0, %v5190_v56  ;;  %v2484_v62 = vmul.f32 %v2482_v57, %v2462_v38 }
 0xa1b   :  { %v2483_v60 = vmul.f32 0.5, %v2481_v58 }
 0xa1d   :  { %v2485_v63 = vmul.f32 %v2483_v60, %v2465_v44 }
 0xa1f   :  { %v2486_v0 = vpack.c.bf16 %v2485_v63, %v2484_v62 }
 0xa21   :  { %4911 = vmatmul.mubr.msk.bf16.vlgmr.msra.gmra.mxu0 %vm2526_vm14, %v2486_v0 }
 0xa22   :  { %4934 = vmatprep.mubr.msk.f32.mxu0 %vm5248_vm5, %v5247_v59 }
 0xae1   :  { %v2564_v3 = vpop.f32.mrf.mxu0 }
 0xae2   :  { %v2565_v4 = vadd.f32 %v4528_v1, %v2564_v3 }
 0xae3   :  { %v4912_v5 = vpop.f32.mrf.mxu0 }
 0xae4   :  { %v5836_v45 = vadd.f32 %v2565_v4, %v5780_v61 }
 0xae5   :  { %v2567_v6 = vpop.f32.mrf.mxu0 }
 0xae6   :  { %v2568_v7 = vadd.f32 %v4528_v1, %v2567_v6  ;;  %v2577_v8 = vsel %vm786_vm3, %v5836_v45, 0.0 }
 0xae7   :  { %2578 = vadd.xlane.f32.xlu0 %v2577_v8  ;;  %v4913_v42 = vpop.f32.mrf.mxu0 }
 0xae8   :  { %v5841_v9 = vadd.f32 %v2568_v7, %v5785_v2 }
 0xaea   :  { %v2580_v10 = vsel %vm790_vm4, %v5841_v9, 0.0 }
 0xaeb   :  { %2581 = vadd.xlane.f32.xlu1 %v2580_v10 }
 0xb70   :  { %v2579_v11 = vpop.xlane.xlu0 %2578 }
 0xb71   :  { %v2583_v12 = vmul.f32 0.03125, %v2579_v11 }
 0xb73   :  { %v2585_v13 = vsub.f32 %v5836_v45, %v2583_v12 }
 0xb74   :  { %v2582_v61 = vpop.xlane.xlu1 %2581 }
 0xb75   :  { %v2584_v15 = vmul.f32 0.03125, %v2582_v61  ;;  %v2587_v16 = vmul.f32 %v2585_v13, %v2585_v13 }
 0xb77   :  { %v2586_v17 = vsub.f32 %v5841_v9, %v2584_v15  ;;  %v2589_v18 = vsel %vm786_vm3, %v2587_v16, 0.0 }
 0xb78   :  { %2590 = vadd.xlane.f32.xlu0 %v2589_v18 }
 0xb79   :  { %v2588_v19 = vmul.f32 %v2586_v17, %v2586_v17 }
 0xb7b   :  { %v2592_v2 = vsel %vm790_vm4, %v2588_v19, 0.0 }
 0xb7c   :  { %2593 = vadd.xlane.f32.xlu1 %v2592_v2 }
 0xc01   :  { %v2591_v22 = vpop.xlane.xlu0 %2590 }
 0xc02   :  { %v2595_v23 = vmul.f32 0.03125, %v2591_v22 }
 0xc04   :  { %v2597_v25 = vadd.f32 1e-06, %v2595_v23 }
 0xc05   :  { %v2594_v26 = vpop.xlane.xlu1 %2593 }
 0xc06   :  { %5191 = vrsqrt.f32 %v2597_v25  ;;  %v2596_v27 = vmul.f32 0.03125, %v2594_v26 }
 0xc08   :  { %v2598_v28 = vadd.f32 1e-06, %v2596_v27 }
 0xc0a   :  { %5193 = vrsqrt.f32 %v2598_v28 }
 0xc13   :  { %v5192_v29 = vpop.eup %5191 }
 0xc14   :  { %v2601_v30 = vmul.f32 %v5192_v29, %v2585_v13 }
 0xc16   :  { %v2609_v34 = vmul.f32 %v4536_v31, %v2601_v30 }
 0xc17   :  { %v5194_v32 = vpop.eup %5193 }
 0xc18   :  { %v2602_v33 = vmul.f32 %v5194_v32, %v2586_v17  ;;  %v2617_v14 = vadd.f32 %v4537_v35, %v2609_v34 }
 0xc1a   :  { %v2610_v36 = vmul.f32 %v4536_v31, %v2602_v33 }
 0xc1c   :  { %v2618_v37 = vadd.f32 %v4537_v35, %v2610_v36 }
 0xc1e   :  { %v2619_v38 = vpack.c.bf16 %v2618_v37, %v2617_v14 }
 0xc20   :  { %4919 = vmatmul.mubr.msk.bf16.vlgmr.msra.gmra.mxu1 %vm786_vm3, %v2619_v38 }
 0xc21   :  { %4924 = vmatprep.mubr.msk.f32.mxu1 %vm5248_vm5, %v5247_v59 }
 0xce0   :  { %v5866_v39 = vpop.f32.mrf.mxu1 }
 0xce1   :  { %2771 = vrot.lane.b32.xlu1 %v5866_v39, %s5249_s25  ;;  %2692 = vrot.lane.b32.xlu0 %v5866_v39, %s5250_s26  ;;  %v2689_v46 = vadd.f32 %v4546_v43, %v5866_v39  ;;  %v3008_v49 = vrot.slane %v5866_v39, 5 }
 0xce2   :  { %v4920_v40 = vpop.f32.mrf.mxu1 }
 0xce3   :  { %v3004_v51 = vrot.slane %v2689_v46, 5 }
 0xce4   :  { %v2677_v41 = vpop.f32.mrf.mxu1 }
 0xce5   :  { %2849 = vrot.lane.b32.xlu1 %v5866_v39, %s5251_s29  ;;  %2927 = vrot.lane.b32.xlu0 %v5866_v39, %s5252_s2  ;;  %v2690_v47 = vadd.f32 %v4546_v43, %v2677_v41  ;;  %v3009_v48 = vrot.slane %v2677_v41, 5 }
 0xce6   :  { %v4921_v44 = vpop.f32.mrf.mxu1 }
 0xce7   :  { %v3005_v24 = vrot.slane %v2690_v47, 5  ;;  %v5884_v50 = vsel %vm1215_vm6, %v3008_v49, %v3009_v48 }
 0xce9   :  { %2925 = vrot.lane.b32.xlu0 %v2689_v46, %s5253_s0  ;;  %2769 = vrot.lane.b32.xlu1 %v2689_v46, %s5254_s30  ;;  %v3006_v52 = vsel %vm1215_vm6, %v3004_v51, %v3005_v24 }
 0xced   :  { %2847 = vrot.lane.b32.xlu1 %v2689_v46, %s5255_s18  ;;  %3089 = vrot.lane.b32.xlu0 %v5884_v50, %s5249_s25  ;;  %s6137_s25 = smov 64  }
 0xcf1   :  { %3011 = vrot.lane.b32.xlu1 %v5884_v50, %s5250_s26  ;;  %3087 = vrot.lane.b32.xlu0 %v3006_v52, %s5254_s30  ;;  %s6138_s26 = smov 8  }
 0xcf5   :  { %3167 = vrot.lane.b32.xlu1 %v5884_v50, %s5251_s29  ;;  %3245 = vrot.lane.b32.xlu0 %v5884_v50, %s5252_s2 }
 0xcf9   :  { %3165 = vrot.lane.b32.xlu1 %v3006_v52, %s5255_s18  ;;  %s6139_s18 = smov 24  }
 0xcfd   :  { %3243 = vrot.lane.b32.xlu1 %v3006_v52, %s5253_s0 }
 0xd53   :  { %v2772_v53 = vpop.permute.xlu1 %2771  ;;  %v2693_v54 = vpop.permute.xlu0 %2692 }
 0xd54   :  { %4923 = vmatpush3.xpose.msk.msra.mxu1 %vm904_vm7, %v2693_v54 }
 0xd55   :  { %4927 = vmatprep.subr.mxu1 %v5247_v59 }
 0xd57   :  { %v2850_v55 = vpop.permute.xlu1 %2849  ;;  %v2928_v56 = vpop.permute.xlu0 %2927  ;;  %4925 = vmatmul.mubr.msk.f32.vlgmr.msra.gmra.mxu1 %vm904_vm7, %v2689_v46 }
 0xd58   :  { %4928 = vmatpush3.xpose.msk.msra.mxu1 %vm904_vm7, %v2772_v53  ;;  %4933 = vmatpush3.xpose.msk.msra.mxu0 %vm904_vm7, %v2850_v55 }
 0xd59   :  { %4929 = vmatprep.mubr.msk.f32.mxu1 %vm5248_vm5, %v5247_v59  ;;  %4937 = vmatprep.subr.mxu1 %v5247_v59 }
 0xd5a   :  { %4942 = vmatprep.subr.mxu0 %v5247_v59 }
 0xd5b   :  { %v2926_v57 = vpop.permute.xlu0 %2925  ;;  %v2770_v58 = vpop.permute.xlu1 %2769 }
 0xd5c   :  { %4930 = vmatmul.mubr.msk.f32.vlgmr.msra.gmra.mxu1 %vm904_vm7, %v2770_v58 }
 0xd5d   :  { %4938 = vmatpush3.xpose.msk.msra.mxu1 %vm904_vm7, %v2928_v56  ;;  %4939 = vmatprep.mubr.msk.f32.mxu1 %vm5248_vm5, %v5247_v59 }
 0xd5e   :  { %4947 = vmatprep.subr.mxu1 %v5247_v59 }
 0xd5f   :  { %v2848_v60 = vpop.permute.xlu1 %2847  ;;  %v3090_v62 = vpop.permute.xlu0 %3089 }
 0xd60   :  { %4935 = vmatmul.mubr.msk.f32.vlgmr.msra.gmra.mxu0 %vm904_vm7, %v2848_v60  ;;  %4940 = vmatmul.mubr.msk.f32.vlgmr.msra.gmra.mxu1 %vm904_vm7, %v2926_v57 }
 0xd61   :  { %4948 = vmatpush3.xpose.msk.msra.mxu1 %vm904_vm7, %v3090_v62  ;;  %4949 = vmatprep.mubr.msk.f32.mxu1 %vm5248_vm5, %v5247_v59 }
 0xd62   :  { %4944 = vmatprep.mubr.msk.f32.mxu0 %vm5248_vm5, %v5247_v59  ;;  %4957 = vmatprep.subr.mxu1 %v5247_v59 }
 0xd63   :  { %v3012_v63 = vpop.permute.xlu1 %3011  ;;  %v3088_v0 = vpop.permute.xlu0 %3087 }
 0xd64   :  { %4943 = vmatpush3.xpose.msk.msra.mxu0 %vm904_vm7, %v3012_v63  ;;  %4950 = vmatmul.mubr.msk.f32.vlgmr.msra.gmra.mxu1 %vm904_vm7, %v3088_v0 }
 0xd65   :  { %4952 = vmatprep.subr.mxu0 %v5247_v59  ;;  %4959 = vmatprep.mubr.msk.f32.mxu1 %vm5248_vm5, %v5247_v59 }
 0xd67   :  { %v3168_v1 = vpop.permute.xlu1 %3167  ;;  %v3246_v3 = vpop.permute.xlu0 %3245  ;;  %4945 = vmatmul.mubr.msk.f32.vlgmr.msra.gmra.mxu0 %vm904_vm7, %v3006_v52 }
 0xd68   :  { %4953 = vmatpush3.xpose.msk.msra.mxu0 %vm904_vm7, %v3168_v1  ;;  %4958 = vmatpush3.xpose.msk.msra.mxu1 %vm904_vm7, %v3246_v3 }
 0xd69   :  { %4954 = vmatprep.mubr.msk.f32.mxu0 %vm5248_vm5, %v5247_v59  ;;  %4967 = vmatprep.subr.mxu1 %v5247_v59 }
 0xd6a   :  { %4962 = vmatprep.subr.mxu0 %v5247_v59 }
 0xd6b   :  { %v3166_v4 = vpop.permute.xlu1 %3165 }
 0xd6c   :  { %4955 = vmatmul.mubr.msk.f32.vlgmr.msra.gmra.mxu0 %vm904_vm7, %v3166_v4 }
 0xd6d   :  { %4964 = vmatprep.mubr.msk.f32.mxu0 %vm5248_vm5, %v5247_v59 }
 0xd6f   :  { %v3244_v5 = vpop.permute.xlu1 %3243 }
 0xd70   :  { %4960 = vmatmul.mubr.msk.f32.vlgmr.msra.gmra.mxu1 %vm904_vm7, %v3244_v5 }
 0xd71   :  { %4969 = vmatprep.mubr.msk.f32.mxu1 %vm5248_vm5, %v5247_v59 }
 0xe17   :  { %v2765_v6 = vpop.f32.mrf.mxu1 }
 0xe19   :  { %v4926_v7 = vpop.f32.mrf.mxu1 }
 0xe1c   :  { %v2843_v8 = vpop.f32.mrf.mxu1 }
 0xe1d   :  { %v3322_v42 = vrot.slane %v2843_v8, 3 }
 0xe1e   :  { %v4931_v10 = vpop.f32.mrf.mxu1 }
 0xe1f   :  { %v3342_v11 = vsel %vm780_vm1, %v2765_v6, %v3322_v42 }
 0xe20   :  { %v2921_v12 = vpop.f32.mrf.mxu0  ;;  %v2999_v13 = vpop.f32.mrf.mxu1  ;;  %v3349_v61 = vsel %vm1564_vm8, %v3342_v11, -inf }
 0xe21   :  { %v3325_v15 = vrot.slane %v2921_v12, 6  ;;  %v3328_v16 = vrot.slane %v2999_v13, 1  ;;  %3350 = vmax.xlane.f32.xlu0 %v3349_v61 }
 0xe22   :  { %v4936_v17 = vpop.f32.mrf.mxu0  ;;  %v4941_v18 = vpop.f32.mrf.mxu1 }
 0xe23   :  { %v3343_v19 = vsel %vm1555_vm9, %v3322_v42, %v3325_v15 }
 0xe24   :  { %v3161_v2 = vpop.f32.mrf.mxu1  ;;  %v3344_v20 = vsel %vm1557_vm10, %v3343_v19, %v3328_v16 }
 0xe25   :  { %v3352_v21 = vsel %vm1564_vm8, %v3344_v20, -inf  ;;  %v3334_v29 = vrot.slane %v3161_v2, 7 }
 0xe26   :  { %3353 = vmax.xlane.f32.xlu1 %v3352_v21  ;;  %v4951_v22 = vpop.f32.mrf.mxu1 }
 0xe27   :  { %v3083_v23 = vpop.f32.mrf.mxu0 }
 0xe28   :  { %v3331_v25 = vrot.slane %v3083_v23, 4 }
 0xe29   :  { %v4946_v26 = vpop.f32.mrf.mxu0 }
 0xe2a   :  { %v3345_v27 = vsel %vm1559_vm11, %v3328_v16, %v3331_v25  ;;  %v3346_v33 = vsel %vm778_vm0, %v3331_v25, %v3334_v29 }
 0xe2b   :  { %v3355_v28 = vsel %vm1564_vm8, %v3345_v27, -inf }
 0xe2c   :  { %v3239_v30 = vpop.f32.mrf.mxu0  ;;  %3356 = vmax.xlane.f32.xlu0 %v3355_v28 }
 0xe2d   :  { %v3337_v31 = vrot.slane %v3239_v30, 2 }
 0xe2e   :  { %v4956_v32 = vpop.f32.mrf.mxu0 }
 0xe2f   :  { %v3347_v34 = vsel %vm782_vm2, %v3346_v33, %v3337_v31 }
 0xe30   :  { %v3317_v35 = vpop.f32.mrf.mxu1  ;;  %v3358_v36 = vsel %vm1564_vm8, %v3347_v34, -inf }
 0xe31   :  { %v3340_v14 = vrot.slane %v3317_v35, 5  ;;  %3359 = vmax.xlane.f32.xlu0 %v3358_v36 }
 0xe32   :  { %v4961_v37 = vpop.f32.mrf.mxu1 }
 0xe33   :  { %v3348_v38 = vsel %vm1215_vm6, %v3337_v31, %v3340_v14 }
 0xe34   :  { %v3361_v40 = vsel %vm1564_vm8, %v3348_v38, -inf }
 0xe35   :  { %3362 = vmax.xlane.f32.xlu0 %v3361_v40 }
 0xeaa   :  { %v3351_v41 = vpop.xlane.xlu0 %3350 }
 0xeab   :  { %v3364_v43 = vsub.f32 %v3342_v11, %v3351_v41 }
 0xead   :  { %v3369_v44 = vmul.f32 1.442695, %v3364_v43 }
 0xeaf   :  { %5195 = vpow2.f32 %v3369_v44  ;;  %v3354_v46 = vpop.xlane.xlu1 %3353 }
 0xeb0   :  { %v3365_v47 = vsub.f32 %v3344_v20, %v3354_v46 }
 0xeb2   :  { %v3371_v48 = vmul.f32 1.442695, %v3365_v47 }
 0xeb4   :  { %5197 = vpow2.f32 %v3371_v48 }
 0xeb5   :  { %v3357_v53 = vpop.xlane.xlu0 %3356 }
 0xeb6   :  { %v3366_v56 = vsub.f32 %v3345_v27, %v3357_v53 }
 0xeb8   :  { %v3373_v58 = vmul.f32 1.442695, %v3366_v56 }
 0xeba   :  { %v3360_v54 = vpop.xlane.xlu0 %3359 }
 0xebb   :  { %v3367_v55 = vsub.f32 %v3347_v34, %v3360_v54 }
 0xebc   :  { %v5196_v49 = vpop.eup %5195 }
 0xebd   :  { %v3379_v24 = vsel %vm1564_vm8, %v5196_v49, 0.0  ;;  %v3375_v57 = vmul.f32 1.442695, %v3367_v55 }
 0xebe   :  { %3380 = vadd.xlane.f32.xlu1 %v3379_v24 }
 0xebf   :  { %5199 = vpow2.f32 %v3375_v57 }
 0xec0   :  { %5201 = vpow2.f32 %v3373_v58  ;;  %v5151_v58 = vld [vmem:[%s6112_s7 + $0x18] sm:$0xff]  }
 0xec1   :  { %v5198_v51 = vpop.eup %5197 }
 0xec2   :  { %v3382_v52 = vsel %vm1564_vm8, %v5198_v51, 0.0 }
 0xec3   :  { %3383 = vadd.xlane.f32.xlu0 %v3382_v52 }
 0xecc   :  { %v5200_v60 = vpop.eup %5199 }
 0xecd   :  { %v5202_v62 = vpop.eup %5201  ;;  %v3388_v63 = vsel %vm1564_vm8, %v5200_v60, 0.0 }
 0xece   :  { %v3385_v0 = vsel %vm1564_vm8, %v5202_v62, 0.0 }
 0xecf   :  { %3485 = vrot.lane.b32.xlu1 %v5866_v39, %s5256_s19 }
 0xed3   :  { %3562 = vrot.lane.b32.xlu1 %v5866_v39, %s5257_s1 }
 0xed7   :  { %3642 = vrot.lane.b32.xlu1 %v5866_v39, %s6136_s6 }
 0xed9   :  { %3404 = vrot.lane.b32.xlu0 %v5866_v39, %s6137_s25  ;;  %v3363_v39 = vpop.xlane.xlu0 %3362 }
 0xeda   :  { %v3368_v1 = vsub.f32 %v3348_v38, %v3363_v39 }
 0xedc   :  { %v3377_v3 = vmul.f32 1.442695, %v3368_v1 }
 0xede   :  { %5203 = vpow2.f32 %v3377_v3 }
 0xeeb   :  { %v5969_v4 = vpop.eup %5203 }
 0xeec   :  { %v3391_v5 = vsel %vm1564_vm8, %v5969_v4, 0.0 }
 0xef8   :  { %3389 = vadd.xlane.f32.xlu0 %v3388_v63 }
 0xefb   :  { %3386 = vadd.xlane.f32.xlu1 %v3385_v0 }
 0xf0c   :  { %3814 = vrot.lane.b32.xlu1 %v5884_v50, %s5256_s19  ;;  %s6140_s19 = smov 16  }
 0xf0e   :  { %3737 = vrot.lane.b32.xlu0 %v5884_v50, %s6137_s25 }
 0xf12   :  { %3894 = vrot.lane.b32.xlu0 %v5884_v50, %s5257_s1 }
 0xf30   :  { %3392 = vadd.xlane.f32.xlu1 %v3391_v5 }
 0xf41   :  { %3971 = vrot.lane.b32.xlu1 %v5884_v50, %s6136_s6 }
 0xf47   :  { %v3381_v6 = vpop.xlane.xlu1 %3380 }
 0xf48   :  { %5205 = vrcp.f32 %v3381_v6 }
 0xf4b   :  { %v3486_v7 = vpop.permute.xlu1 %3485 }
 0xf4c   :  { %4968 = vmatpush3.msk.msra.mxu1 %vm780_vm1, %v3486_v7  ;;  %v3384_v8 = vpop.xlane.xlu0 %3383 }
 0xf4d   :  { %5207 = vrcp.f32 %v3384_v8  ;;  %4977 = vmatprep.subr.mxu1 %v5247_v59 }
 0xf4f   :  { %v3563_v12 = vpop.permute.xlu1 %3562 }
 0xf50   :  { %v3405_v42 = vpop.permute.xlu0 %3404 }
 0xf51   :  { %4963 = vmatpush3.msk.msra.mxu0 %vm780_vm1, %v3405_v42 }
 0xf52   :  { %4972 = vmatprep.subr.mxu0 %v5247_v59 }
 0xf53   :  { %v3643_v18 = vpop.permute.xlu1 %3642 }
 0xf55   :  { %v5206_v10 = vpop.eup %5205 }
 0xf56   :  { %v3399_v11 = vmul.f32 %v5206_v10, %v5196_v49 }
 0xf58   :  { %4965 = vmatmul.mubr.msk.f32.vlgmr.msra.gmra.mxu0 %vm1564_vm8, %v3399_v11  ;;  %v3482_v15 = vrot.slane %v3399_v11, 5 }
 0xf59   :  { %4973 = vmatpush3.msk.msra.mxu0 %vm780_vm1, %v3563_v12  ;;  %4974 = vmatprep.mubr.msk.f32.mxu0 %vm5248_vm5, %v5247_v59 }
 0xf5a   :  { %v5208_v50 = vpop.eup %5207  ;;  %4982 = vmatprep.subr.mxu0 %v5247_v59 }
 0xf5b   :  { %v3400_v13 = vmul.f32 %v5208_v50, %v5198_v51 }
 0xf5d   :  { %v3561_v61 = vrot.slane %v3400_v13, 2  ;;  %v3483_v16 = vrot.slane %v3400_v13, 5  ;;  %v3639_v26 = vrot.slane %v3400_v13, 7 }
 0xf5f   :  { %4975 = vmatmul.mubr.msk.f32.vlgmr.msra.gmra.mxu0 %vm1564_vm8, %v3561_v61  ;;  %v3484_v17 = vsel %vm1215_vm6, %v3482_v15, %v3483_v16 }
 0xf60   :  { %4970 = vmatmul.mubr.msk.f32.vlgmr.msra.gmra.mxu1 %vm1564_vm8, %v3484_v17  ;;  %4984 = vmatprep.mubr.msk.f32.mxu0 %vm5248_vm5, %v5247_v59 }
 0xf61   :  { %4978 = vmatpush3.msk.msra.mxu1 %vm780_vm1, %v3643_v18  ;;  %4979 = vmatprep.mubr.msk.f32.mxu1 %vm5248_vm5, %v5247_v59 }
 0xf62   :  { %4987 = vmatprep.subr.mxu1 %v5247_v59 }
 0xf81   :  { %v3390_v19 = vpop.xlane.xlu0 %3389 }
 0xf82   :  { %5209 = vrcp.f32 %v3390_v19 }
 0xf84   :  { %v3387_v2 = vpop.xlane.xlu1 %3386 }
 0xf85   :  { %5211 = vrcp.f32 %v3387_v2  ;;  %v3738_v20 = vpop.permute.xlu0 %3737  ;;  %v4587_v2 = vld [vmem:[%s6113_s8 + $0x1] ss:$0 sm:$0xff] }
 0xf86   :  { %4983 = vmatpush3.msk.msra.mxu0 %vm780_vm1, %v3738_v20 }
 0xf87   :  { %4992 = vmatprep.subr.mxu0 %v5247_v59 }
 0xf88   :  { %v3815_v32 = vpop.permute.xlu1 %3814 }
 0xf89   :  { %v3895_v33 = vpop.permute.xlu0 %3894 }
 0xf8f   :  { %v5210_v21 = vpop.eup %5209 }
 0xf90   :  { %v3402_v22 = vmul.f32 %v5210_v21, %v5200_v60  ;;  %v5152_v60 = vld [vmem:[%s6112_s7 + $0x10] sm:$0xff]  }
 0xf92   :  { %v5212_v23 = vpop.eup %5211  ;;  %v3735_v29 = vrot.slane %v3402_v22, 4  ;;  %v3813_v34 = vrot.slane %v3402_v22, 1  ;;  %v3891_v40 = vrot.slane %v3402_v22, 6 }
 0xf93   :  { %v3401_v25 = vmul.f32 %v5212_v23, %v5202_v62 }
 0xf95   :  { %v3640_v27 = vrot.slane %v3401_v25, 7  ;;  %v3734_v28 = vrot.slane %v3401_v25, 4 }
 0xf97   :  { %v3641_v30 = vsel %vm778_vm0, %v3639_v26, %v3640_v27  ;;  %v3736_v31 = vsel %vm1559_vm11, %v3734_v28, %v3735_v29 }
 0xf98   :  { %4980 = vmatmul.mubr.msk.f32.vlgmr.msra.gmra.mxu1 %vm1564_vm8, %v3641_v30  ;;  %4985 = vmatmul.mubr.msk.f32.vlgmr.msra.gmra.mxu0 %vm1564_vm8, %v3736_v31 }
 0xf99   :  { %4988 = vmatpush3.msk.msra.mxu1 %vm780_vm1, %v3815_v32  ;;  %4993 = vmatpush3.msk.msra.mxu0 %vm780_vm1, %v3895_v33 }
 0xf9a   :  { %4989 = vmatprep.mubr.msk.f32.mxu1 %vm5248_vm5, %v5247_v59  ;;  %4997 = vmatprep.subr.mxu1 %v5247_v59 }
 0xf9b   :  { %4994 = vmatprep.mubr.msk.f32.mxu0 %vm5248_vm5, %v5247_v59  ;;  %5002 = vmatprep.subr.bf16.mxu0 %v5247_v59 }
 0xf9c   :  { %4990 = vmatmul.mubr.msk.f32.vlgmr.msra.gmra.mxu1 %vm1564_vm8, %v3813_v34 }
 0xf9d   :  { %4999 = vmatprep.mubr.msk.f32.mxu1 %vm5248_vm5, %v5247_v59 }
 0xfb9   :  { %v3393_v35 = vpop.xlane.xlu1 %3392 }
 0xfba   :  { %5213 = vrcp.f32 %v3393_v35 }
 0xfbd   :  { %v3972_v36 = vpop.permute.xlu1 %3971 }
 0xfbe   :  { %4998 = vmatpush3.msk.msra.mxu1 %vm780_vm1, %v3972_v36 }
 0xfbf   :  { %5010 = vmatprep.subr.bf16.mxu1 %v5247_v59 }
 0xfc7   :  { %v5214_v14 = vpop.eup %5213 }
 0xfc8   :  { %v3403_v37 = vmul.f32 %v5214_v14, %v5969_v4 }
 0xfca   :  { %v3970_v38 = vrot.slane %v3403_v37, 3  ;;  %v3892_v41 = vrot.slane %v3403_v37, 6  ;;  %v5153_v37 = vld [vmem:[%s6116_s11 + $0x18] sm:$0xff]  }
 0xfcc   :  { %5000 = vmatmul.mubr.msk.f32.vlgmr.msra.gmra.mxu1 %vm1564_vm8, %v3970_v38  ;;  %v3893_v43 = vsel %vm1555_vm9, %v3891_v40, %v3892_v41  ;;  %v5154_v38 = vld [vmem:[%s6116_s11 + $0x10] sm:$0xff]  }
 0xfcd   :  { %4995 = vmatmul.mubr.msk.f32.vlgmr.msra.gmra.mxu0 %vm1564_vm8, %v3893_v43  ;;  %5014 = vmatprep.mubr.msk.bf16.mxu1 %vm5248_vm5, %v5247_v59 }
 0xfce   :  { %5006 = vmatprep.mubr.msk.bf16.mxu0 %vm5248_vm5, %v5247_v59  ;;  %5003 = vmatpush3.bf16.msra.mxu0 %v5151_v58 }
 0xfcf   :  { %5004 = vmatprep.subr.bf16.mxu0 %v5247_v59  ;;  %5011 = vmatpush3.bf16.msra.mxu1 %v5153_v37 }
 0xfd0   :  { %5012 = vmatprep.subr.bf16.mxu1 %v5247_v59 }
 0xfd2   :  { %5005 = vmatpush3.bf16.msra.mxu0 %v5152_v60  ;;  %v5155_v60 = vld [vmem:[%s6118_s13 + $0x38] sm:$0xff]  }
 0xfd3   :  { %5018 = vmatprep.subr.bf16.mxu0 %v5247_v59  ;;  %5013 = vmatpush3.bf16.msra.mxu1 %v5154_v38 }
0x1018   :  { %v3477_v44 = vpop.f32.mrf.mxu0 }
0x101a   :  { %v4966_v46 = vpop.f32.mrf.mxu0 }
0x101f   :  { %v3634_v47 = vpop.f32.mrf.mxu0 }
0x1020   :  { %v3557_v48 = vpop.f32.mrf.mxu1 }
0x1021   :  { %v4976_v49 = vpop.f32.mrf.mxu0 }
0x1022   :  { %v4971_v24 = vpop.f32.mrf.mxu1 }
0x1023   :  { %v4590_v24 = vld [vmem:[%s6114_s9 + $0x1] ss:$0 sm:$0xff] }
0x1058   :  { %v3714_v51 = vpop.f32.mrf.mxu1  ;;  %v3809_v52 = vpop.f32.mrf.mxu0 }
0x105a   :  { %v4981_v53 = vpop.f32.mrf.mxu1  ;;  %v4986_v54 = vpop.f32.mrf.mxu0 }
0x105b   :  { %v4591_v54 = vld [vmem:[%s6115_s10 + $0x1] ss:$0 sm:$0xff] }
0x105c   :  { %v3886_v55 = vpop.f32.mrf.mxu1 }
0x105d   :  { %v5057_v56 = vpack.i.bf16 %v3557_v48, %v3886_v55 }
0x105e   :  { %v4991_v57 = vpop.f32.mrf.mxu1 }
0x105f   :  { %5058 = vrot.lane.b32.xlu0 %v5057_v56, %s6138_s26 }
0x108c   :  { %v4043_v62 = vpop.f32.mrf.mxu1 }
0x108d   :  { %v3966_v63 = vpop.f32.mrf.mxu0  ;;  %4056 = vrot.lane.b32.xlu0 %v4043_v62, %s6139_s18  ;;  %v5156_v62 = vld [vmem:[%s6118_s13 + $0x30] sm:$0xff]  }
0x108e   :  { %v5062_v0 = vpack.i.bf16 %v3634_v47, %v3966_v63  ;;  %v5001_v39 = vpop.f32.mrf.mxu1  ;;  %v5157_v63 = vld [vmem:[%s6118_s13 + $0x28] sm:$0xff]  }
0x108f   :  { %v4996_v1 = vpop.f32.mrf.mxu0  ;;  %v4597_v39 = vld [vmem:[%s6117_s12 + $0x1] ss:$0 sm:$0xff] }
0x1090   :  { %5063 = vrot.lane.b32.xlu1 %v5062_v0, %s6140_s19  ;;  %v5158_v0 = vld [vmem:[%s6118_s13 + $0x20] sm:$0xff]  }
0x1094   :  { %3727 = vrot.lane.b32.xlu1 %v3714_v51, %s6139_s18  ;;  %s5263_s18 = smov [#allocation2]  }
0x1095   :  { %s4400_s19 = sshll.u32 %s5263_s18, 4  ;;  %s4401_s19 = int_to_ptr.vmem [resolvable:$true] %s4400_s19 }
0x1096   :  { %s5225_s7 = scalar_lea.vmem %s4401_s19, 32  ;;  %p5230_p1 = scmp.lt.s32.totalorder %s4401_s19, %s4401_s19 }
0x1097   :  { %p5226_p0 = scmp.ne.s32.totalorder %s4401_s19, %s5225_s7  ;;  %p5231_p2 = scmp.lt.s32.totalorder %s5225_s7, %s5225_s7 }
0x1099   :  { %p5232_p3 = por %p5231_p2, %p5230_p1 }
0x109b   :  { %p5233_p4 = pnand %p5232_p3, %p5226_p0 }
0x10d1   :  { %v5059_v3 = vpop.permute.xlu0 %5058 }
0x10d2   :  { %v5061_v4 = vunpack.i.h.bf16 %v5059_v3  ;;  %v5060_v5 = vunpack.i.l.bf16 %v5059_v3 }
0x10d4   :  { %v4059_v42 = vsel %vm904_vm7, %v3809_v52, %v5060_v5  ;;  %v3730_v10 = vsel %vm904_vm7, %v3477_v44, %v5061_v4 }
0x10ff   :  { %v4057_v11 = vpop.permute.xlu0 %4056 }
0x1102   :  { %v5064_v6 = vpop.permute.xlu1 %5063 }
0x1103   :  { %v5066_v7 = vunpack.i.h.bf16 %v5064_v6  ;;  %v5065_v8 = vunpack.i.l.bf16 %v5064_v6 }
0x1105   :  { %v4060_v12 = vsel %vm1947_vm12, %v4059_v42, %v5065_v8  ;;  %v3731_v50 = vsel %vm1947_vm12, %v3730_v10, %v5066_v7 }
0x1106   :  { %v3728_v13 = vpop.permute.xlu1 %3727  ;;  %v4061_v61 = vsel %vm1949_vm13, %v4060_v12, %v4057_v11 }
0x1107   :  { %v3732_v15 = vsel %vm1949_vm13, %v3731_v50, %v3728_v13  ;;  %v4063_v16 = vrot.slane %v4061_v61, 3 }
0x1109   :  { %v4065_v17 = vsel %vm780_vm1, %v3732_v15, %v4063_v16 }
0x110a   :  { %v4066_v18 = vpack.c.bf16 %v4063_v16, %v4065_v17 }
0x110c   :  { %5007 = vmatmul.mubr.msk.bf16.vlgmr.msra.gmra.mxu0 %vm786_vm3, %v4066_v18 }
0x110d   :  { %5026 = vmatprep.mubr.msk.bf16.mxu0 %vm5248_vm5, %v5247_v59  ;;  %5019 = vmatpush3.bf16.msra.mxu0 %v5155_v60 }
0x110e   :  { %5020 = vmatprep.subr.bf16.mxu0 %v5247_v59 }
0x1111   :  { %5021 = vmatpush3.bf16.msra.mxu0 %v5156_v62 }
0x1112   :  { %5022 = vmatprep.subr.bf16.mxu0 %v5247_v59 }
0x1115   :  { %5023 = vmatpush3.bf16.msra.mxu0 %v5157_v63 }
0x1116   :  { %5024 = vmatprep.subr.bf16.mxu0 %v5247_v59 }
0x1119   :  { %5025 = vmatpush3.bf16.msra.mxu0 %v5158_v0 }
0x11cc   :  { %v4121_v19 = vpop.f32.mrf.mxu0 }
0x11cd   :  { %v4128_v20 = vadd.f32 %v4121_v19, %v5836_v45 }
0x11ce   :  { %v5008_v21 = vpop.f32.mrf.mxu0 }
0x11cf   :  { %v6046_v22 = vadd.f32 %v4587_v2, %v4128_v20 }
0x11d0   :  { %v4124_v23 = vpop.f32.mrf.mxu0 }
0x11d1   :  { %v4129_v25 = vadd.f32 %v4124_v23, %v5841_v9  ;;  %v4144_v26 = vsel %vm786_vm3, %v6046_v22, 0.0 }
0x11d2   :  { %4145 = vadd.xlane.f32.xlu0 %v4144_v26  ;;  %v5009_v27 = vpop.f32.mrf.mxu0  ;;  %v4610_v26 = vld [vmem:[%s6119_s14 + $0x1] ss:$0 sm:$0xff] }
0x11d3   :  { %v4139_v28 = vadd.f32 %v4587_v2, %v4129_v25 }
0x11d5   :  { %v4147_v29 = vsel %vm790_vm4, %v4139_v28, 0.0 }
0x11d6   :  { %4148 = vadd.xlane.f32.xlu1 %v4147_v29 }
0x125b   :  { %v4146_v30 = vpop.xlane.xlu0 %4145 }
0x125c   :  { %v4150_v31 = vmul.f32 0.03125, %v4146_v30 }
0x125e   :  { %v4152_v32 = vsub.f32 %v6046_v22, %v4150_v31 }
0x125f   :  { %v4149_v45 = vpop.xlane.xlu1 %4148 }
0x1260   :  { %v4151_v33 = vmul.f32 0.03125, %v4149_v45  ;;  %v4154_v34 = vmul.f32 %v4152_v32, %v4152_v32 }
0x1262   :  { %v4153_v35 = vsub.f32 %v4139_v28, %v4151_v33  ;;  %v4156_v36 = vsel %vm786_vm3, %v4154_v34, 0.0 }
0x1263   :  { %4157 = vadd.xlane.f32.xlu0 %v4156_v36 }
0x1264   :  { %v4155_v9 = vmul.f32 %v4153_v35, %v4153_v35 }
0x1266   :  { %v4159_v14 = vsel %vm790_vm4, %v4155_v9, 0.0 }
0x1267   :  { %4160 = vadd.xlane.f32.xlu0 %v4159_v14 }
0x12ec   :  { %v4158_v40 = vpop.xlane.xlu0 %4157 }
0x12ed   :  { %v4162_v41 = vmul.f32 0.03125, %v4158_v40 }
0x12ef   :  { %v4164_v43 = vadd.f32 1e-06, %v4162_v41 }
0x12f0   :  { %v4161_v44 = vpop.xlane.xlu0 %4160 }
0x12f1   :  { %5215 = vrsqrt.f32 %v4164_v43  ;;  %v4163_v46 = vmul.f32 0.03125, %v4161_v44  ;;  %v4616_v43 = vld [vmem:[%s6120_s15] ss:$0 sm:$0xff] }
0x12f3   :  { %v4165_v47 = vadd.f32 1e-06, %v4163_v46  ;;  %v4617_v46 = vld [vmem:[%s6121_s16] ss:$0 sm:$0xff] }
0x12f5   :  { %5217 = vrsqrt.f32 %v4165_v47 }
0x12fe   :  { %v5216_v48 = vpop.eup %5215 }
0x12ff   :  { %v4168_v49 = vmul.f32 %v5216_v48, %v4152_v32 }
0x1301   :  { %v4176_v53 = vmul.f32 %v4590_v24, %v4168_v49 }
0x1302   :  { %v5218_v51 = vpop.eup %5217 }
0x1303   :  { %v4169_v52 = vmul.f32 %v5218_v51, %v4153_v35  ;;  %v4184_v56 = vadd.f32 %v4591_v54, %v4176_v53 }
0x1305   :  { %v4177_v55 = vmul.f32 %v4590_v24, %v4169_v52 }
0x1307   :  { %v4185_v57 = vadd.f32 %v4591_v54, %v4177_v55 }
0x1309   :  { %v4186_v58 = vpack.c.bf16 %v4185_v57, %v4184_v56 }
0x130b   :  { %5015 = vmatmul.mubr.msk.bf16.vlgmr.msra.gmra.mxu1 %vm786_vm3, %v4186_v58 }
0x13cb   :  { %v4249_v1 = vpop.f32.mrf.mxu1 }
0x13cc   :  { %v4250_v3 = vadd.f32 %v4597_v39, %v4249_v1 }
0x13cd   :  { %v5016_v4 = vpop.f32.mrf.mxu1 }
0x13ce   :  { %v4256_v5 = vmul.f32 %v4250_v3, %v4250_v3 }
0x13cf   :  { %v4252_v6 = vpop.f32.mrf.mxu1 }
0x13d0   :  { %v4258_v7 = vmul.f32 %v4256_v5, %v4250_v3  ;;  %v4253_v8 = vadd.f32 %v4597_v39, %v4252_v6 }
0x13d1   :  { %v5017_v42 = vpop.f32.mrf.mxu1 }
0x13d2   :  { %v4260_v10 = vmul.f32 0.044715, %v4258_v7  ;;  %v4257_v11 = vmul.f32 %v4253_v8, %v4253_v8 }
0x13d4   :  { %v4262_v59 = vadd.f32 %v4260_v10, %v4250_v3  ;;  %v4259_v12 = vmul.f32 %v4257_v11, %v4253_v8 }
0x13d6   :  { %v4264_v50 = vmul.f32 0.7978846, %v4262_v59  ;;  %v4261_v13 = vmul.f32 0.044715, %v4259_v12 }
0x13d8   :  { %5219 = vtanh.f32 %v4264_v50  ;;  %v4263_v61 = vadd.f32 %v4261_v13, %v4253_v8 }
0x13da   :  { %v4265_v15 = vmul.f32 0.7978846, %v4263_v61 }
0x13dc   :  { %5221 = vtanh.f32 %v4265_v15 }
0x13e5   :  { %v5220_v16 = vpop.eup %5219 }
0x13e6   :  { %v4268_v17 = vadd.f32 1.0, %v5220_v16 }
0x13e8   :  { %v4270_v19 = vmul.f32 0.5, %v4268_v17 }
0x13e9   :  { %v5222_v18 = vpop.eup %5221 }
0x13ea   :  { %v4269_v2 = vadd.f32 1.0, %v5222_v18  ;;  %v4272_v21 = vmul.f32 %v4270_v19, %v4250_v3 }
0x13ec   :  { %v4271_v20 = vmul.f32 0.5, %v4269_v2 }
0x13ee   :  { %v4273_v23 = vmul.f32 %v4271_v20, %v4253_v8 }
0x13f0   :  { %v4274_v25 = vpack.c.bf16 %v4273_v23, %v4272_v21 }
0x13f2   :  { %5027 = vmatmul.mubr.msk.bf16.vlgmr.msra.gmra.mxu0 %vm2526_vm14, %v4274_v25 }
0x14b2   :  { %v4353_v27 = vpop.f32.mrf.mxu0 }
0x14b3   :  { %v4354_v28 = vadd.f32 %v4610_v26, %v4353_v27 }
0x14b4   :  { %v5028_v29 = vpop.f32.mrf.mxu0 }
0x14b5   :  { %v4359_v30 = vadd.f32 %v4354_v28, %v6046_v22 }
0x14b6   :  { %v4356_v31 = vpop.f32.mrf.mxu0 }
0x14b7   :  { %v4361_v32 = vrot.slane %v4359_v30, 4 }
0x14b8   :  { %v5029_v45 = vpop.f32.mrf.mxu0 }
0x14b9   :  { %v4363_v33 = vsel %vm778_vm0, %v4359_v30, %v4361_v32 }
0x14ba   :  { %v4366_v34 = vsel %vm790_vm4, %v4363_v33, 0.0 }
0x14bb   :  { %4367 = vadd.xlane.f32.xlu0 %v4366_v34 }
0x1544   :  { %v4368_v35 = vpop.xlane.xlu0 %4367 }
0x1545   :  { %v4369_v36 = vmul.f32 0.03125, %v4368_v35 }
0x1547   :  { %v4370_v9 = vsub.f32 %v4363_v33, %v4369_v36 }
0x1549   :  { %v4371_v14 = vmul.f32 %v4370_v9, %v4370_v9 }
0x154b   :  { %v4372_v37 = vsel %vm790_vm4, %v4371_v14, 0.0 }
0x154c   :  { %4373 = vadd.xlane.f32.xlu1 %v4372_v37 }
0x15d5   :  { %v4374_v38 = vpop.xlane.xlu1 %4373 }
0x15d6   :  { %v4375_v40 = vmul.f32 0.03125, %v4374_v38 }
0x15d8   :  { %v4376_v41 = vadd.f32 1e-06, %v4375_v40 }
0x15da   :  { %5223 = vrsqrt.f32 %v4376_v41 }
0x15e7   :  { %v5224_v22 = vpop.eup %5223 }
0x15e8   :  { %v4378_v44 = vmul.f32 %v5224_v22, %v4370_v9 }
0x15ea   :  { %v4385_v47 = vmul.f32 %v4616_v43, %v4378_v44 }
0x15ec   :  { %v4392_v48 = vadd.f32 %v4617_v46, %v4385_v47 }
0x15ee   :  { %4393 = vst.msk [vmem:[#allocation2] sm:$0x3] %vm790_vm4, %v4392_v48 }
0x15ef   :  { %5236 = shalt.err (!%p5233_p4)
}
0x15f0   :  { %4403 = dma.vmem_to_hbm [thread:$0]  %s4401_s19, 32, %s6122_s17, [#allocation3]  }
0x15f1   :  { %5245 = dma.done.wait [#allocation3], 32  }
0x15f2   :  { %5246 = vsyncadd [#allocation3], 4294967264 }
0x15f3   :  { %4407 = vsyncpa [#allocation3], 1 }

</bundles_post_ra>
